<compile_context>
chip_gen: v7x
topology: tpu7x:2x2x1
jax: 0.10.0
libtpu: 0.0.40
codegen_flags: <defaults>
</compile_context>

<pallas_src>
import jax
import jax.numpy as jnp
from jax import lax
from jax.experimental import pallas as pl
from jax.experimental.pallas import tpu as pltpu

# ---------------- sizes (small, consistent with the module's structure) ------
B = 2            # batch
BP = 8           # batch padded to one sublane tile
T = 8            # question length
VOCAB = 64       # vocab_size       (10000 in the module)
VPAD = 128       # vocab padded to one lane tile (zero rows)
WORD_EMB = 128   # word_emb_size    (300 in the module)
HID = 128        # LSTM hidden_size (512 in the module)
EMB = 128        # emb_size         (1024 in the module)
IMG_FEAT = 256   # VGG fc7 feature dim (4096 in the module)
OUT = 128        # output_size      (1000 in the module) -- mlp head, unused by forward


# ---------------- fused Pallas kernel -----------------------------------------

def _vqa_fused_kernel(img_ref,                      # (BP, IMG_FEAT) f32 (zero-padded rows)
                      ids_ref,                      # (T*BP, 1) int32 (padded rows = -1)
                      eproj_ref,                    # (VPAD, 4H) bf16  = word_emb @ W_ih
                      w_img_ref, b_img_ref,         # (IMG_FEAT, EMB) bf16, (1, EMB) f32
                      w_hh_ref, b_lstm_ref,         # (HID, 4H) bf16, (1, 4H) f32
                      w_qff_ref, b_qff_ref,         # (2H, EMB) bf16, (1, EMB) f32
                      out_ref,                      # (BP, 2*EMB) f32 : [img_emb || ques_emb]
                      gates_scr):                   # (T*BP, 4H) f32 scratch
    f32 = jnp.float32
    bf16 = jnp.bfloat16

    # ---- image channel: ImageEmbedding.fflayer = tanh(images @ W^T + b) ------
    out_ref[:, 0:EMB] = jnp.tanh(
        jnp.dot(img_ref[...].astype(bf16), w_img_ref[...],
                preferred_element_type=f32) + b_img_ref[...])

    # ---- one-hot gather straight into the pre-projected LSTM input gates -----
    # one_hot (T*BP, VPAD) @ E' (VPAD, 4H) == (word_emb[token] @ W_ih) per row.
    # Padded rows (id = -1) match no iota column -> all-zero gate rows (safe,
    # independent of the real batch rows).  Bounds-safe by construction.
    one_hot = (ids_ref[...] == lax.broadcasted_iota(
        jnp.int32, (T * BP, VPAD), 1)).astype(bf16)
    gates_scr[...] = (jnp.dot(one_hot, eproj_ref[...],
                              preferred_element_type=f32) + b_lstm_ref[...])

    # ---- forward-direction LSTM recurrence (unrolled; gate order i,f,g,o) ----
    # The reference uses only lstm_embedding[0] = [h_fwd || c_fwd]; the backward
    # direction of the bidirectional LSTM never reaches the output.
    # sigmoid(x) = 0.5*(tanh(0.5*x)+1): single EUP op per gate.
    h = jnp.zeros((BP, HID), bf16)
    c = jnp.zeros((BP, HID), f32)
    for t in range(T):
        g = (gates_scr[pl.ds(t * BP, BP), :]              # aligned 8-row slab
             + jnp.dot(h, w_hh_ref[...], preferred_element_type=f32))
        i_g = 0.5 * (jnp.tanh(0.5 * g[:, 0:HID]) + 1.0)
        f_g = 0.5 * (jnp.tanh(0.5 * g[:, HID:2 * HID]) + 1.0)
        g_g = jnp.tanh(g[:, 2 * HID:3 * HID])
        o_g = 0.5 * (jnp.tanh(0.5 * g[:, 3 * HID:4 * HID]) + 1.0)
        c = f_g * c + i_g * g_g
        h = (o_g * jnp.tanh(c)).astype(bf16)

    # ---- QuesEmbedding.fflayer on [h_fwd || c_fwd] ---------------------------
    ques_cat = jnp.concatenate([h, c.astype(bf16)], axis=1)     # (BP, 2*HID)
    out_ref[:, EMB:2 * EMB] = jnp.tanh(
        jnp.dot(ques_cat, w_qff_ref[...],
                preferred_element_type=f32) + b_qff_ref[...])


def _cost_estimate():
    flops = (2 * BP * IMG_FEAT * EMB                   # image fflayer
             + 2 * (T * BP) * VPAD * 4 * HID           # one-hot @ E'
             + T * 2 * BP * HID * 4 * HID              # recurrent h @ W_hh
             + 2 * BP * (2 * HID) * EMB)               # question fflayer
    transcendentals = (BP * EMB                         # img tanh
                       + T * 5 * BP * HID               # 4 gate tanh + tanh(c) per step
                       + BP * EMB)                      # ques tanh
    bytes_accessed = (4 * (BP * IMG_FEAT + T * BP      # f32/int32 inputs
                           + EMB + 4 * HID + EMB
                           + BP * 2 * EMB)              # output slab
                      + 2 * (VPAD * 4 * HID + IMG_FEAT * EMB
                             + HID * 4 * HID + 2 * HID * EMB))  # bf16 weights
    return pl.CostEstimate(flops=flops, transcendentals=transcendentals,
                           bytes_accessed=bytes_accessed)


def vqa_forward(kparams, images, questions, image_ids):
    del image_ids  # unused by the reference forward

    # Pad batch to one sublane tile (8 rows) and flatten token ids to (T*BP, 1);
    # padded ids = -1 so they hit no one-hot column.
    images_pad = jnp.zeros((BP, IMG_FEAT), jnp.float32).at[:B].set(images)
    ids_pad = (jnp.full((T, BP), -1, jnp.int32)
               .at[:, :B].set(questions)
               .reshape(T * BP, 1))

    full = lambda shape: pl.BlockSpec(shape, lambda i: (0, 0))

    fused = pl.pallas_call(
        _vqa_fused_kernel,
        out_shape=jax.ShapeDtypeStruct((BP, 2 * EMB), jnp.float32),
        grid_spec=pltpu.PrefetchScalarGridSpec(
            num_scalar_prefetch=0,
            grid=(1,),
            in_specs=[
                full((BP, IMG_FEAT)),       # images (padded)
                full((T * BP, 1)),          # token ids (padded, flattened)
                full((VPAD, 4 * HID)),      # E' = word_emb @ W_ih (bf16)
                full((IMG_FEAT, EMB)),      # w_img_t
                full((1, EMB)),             # b_img
                full((HID, 4 * HID)),       # w_hh_f_t
                full((1, 4 * HID)),         # b_f (b_ih + b_hh folded)
                full((2 * HID, EMB)),       # w_qff_t
                full((1, EMB)),             # b_qff
            ],
            out_specs=full((BP, 2 * EMB)),
            scratch_shapes=[pltpu.VMEM((T * BP, 4 * HID), jnp.float32)],
        ),
        compiler_params=pltpu.CompilerParams(dimension_semantics=("arbitrary",)),
        cost_estimate=_cost_estimate(),
    )(images_pad, ids_pad,
      kparams["e_proj_pad"],
      kparams["w_img_t"], kparams["b_img"],
      kparams["w_hh_f_t"], kparams["b_f"],
      kparams["w_qff_t"], kparams["b_qff"])

    img_emb = fused[:B, 0:EMB]
    ques_emb = fused[:B, EMB:2 * EMB]

    # MutanFusion.forward and VQAModel.forward both `return 0` in the reference.
    # TODO(synk): no fused Mutan / mlp head is applied because the reference forward returns 0.
    out = jnp.int32(0)
    return out, img_emb, ques_emb


# ---------------- parameter init + one-time weight prep -----------------------

def init_params(key):
    ks = jax.random.split(key, 12)
    s = 0.05

    def rnd(k, shape, dtype=jnp.bfloat16):
        return (s * jax.random.normal(k, shape, dtype=jnp.float32)).astype(dtype)

    params = {
        # ImageEmbedding.fflayer: Linear(IMG_FEAT -> EMB) + Tanh
        "w_img_t": rnd(ks[0], (IMG_FEAT, EMB)),
        "b_img":   rnd(ks[1], (1, EMB), jnp.float32),
        # nn.Embedding(vocab, word_emb)
        "word_emb": rnd(ks[2], (VOCAB, WORD_EMB), jnp.float32),
        # single-layer LSTM, forward direction (the only one the forward consumes)
        "w_ih_f_t": rnd(ks[3], (WORD_EMB, 4 * HID)),
        "w_hh_f_t": rnd(ks[4], (HID, 4 * HID)),
        "b_f":      rnd(ks[5], (1, 4 * HID), jnp.float32),   # b_ih + b_hh folded
        # backward-direction weights exist in the module but are dead in forward
        "w_ih_b_t": rnd(ks[6], (WORD_EMB, 4 * HID)),
        "w_hh_b_t": rnd(ks[7], (HID, 4 * HID)),
        "b_b":      rnd(ks[8], (1, 4 * HID), jnp.float32),
        # QuesEmbedding.fflayer: Linear(2*HID -> EMB) + Tanh
        "w_qff_t": rnd(ks[9], (2 * HID, EMB)),
        "b_qff":   rnd(ks[10], (1, EMB), jnp.float32),
        # VQAModel.mlp: present in __init__, unused by forward
        "w_mlp_t": rnd(ks[11], (EMB, OUT)),
        "b_mlp":   jnp.zeros((1, OUT), jnp.float32),
    }
    return params


def preprocess_params(params):
    """One-time static weight prep: pre-project the embedding table through
    W_ih (bias stays separate in f32) and pad vocab rows to a full lane tile."""
    e_proj = jnp.dot(params["word_emb"],
                     params["w_ih_f_t"].astype(jnp.float32))          # (VOCAB, 4H) f32
    e_proj_pad = jnp.zeros((VPAD, 4 * HID), jnp.float32).at[:VOCAB].set(e_proj)
    kp = dict(params)
    kp["e_proj_pad"] = e_proj_pad.astype(jnp.bfloat16)
    return kp


# ---------------- main ---------------------------------------------------------

if __name__ == "__main__":
    key = jax.random.PRNGKey(0)
    k_par, k_img, k_q = jax.random.split(key, 3)

    params = init_params(k_par)
    kparams = preprocess_params(params)

    images = jax.random.normal(k_img, (B, IMG_FEAT), dtype=jnp.float32)
    questions = jax.random.randint(k_q, (T, B), 0, VOCAB, dtype=jnp.int32)
    image_ids = jnp.arange(B, dtype=jnp.int32)

    out, img_emb, ques_emb = vqa_forward(kparams, images, questions, image_ids)
    jax.block_until_ready((out, img_emb, ques_emb))

    assert int(out) == 0                 # matches PyTorch VQAModel.forward -> 0
    assert img_emb.shape == (B, EMB) and img_emb.dtype == jnp.float32
    assert ques_emb.shape == (B, EMB) and ques_emb.dtype == jnp.float32
    assert bool(jnp.all(jnp.isfinite(img_emb)))
    assert bool(jnp.all(jnp.isfinite(ques_emb)))
    print("KERNEL_OK")
</pallas_src>

<mosaic_0001>
module attributes {stable_mosaic.version = 11 : i64} {
  func.func @_vqa_fused_kernel(%arg0: i32, %arg1: memref<8x256xf32, #tpu.memory_space<vmem>>, %arg2: memref<64x1xi32, #tpu.memory_space<vmem>>, %arg3: memref<128x512xbf16, #tpu.memory_space<vmem>>, %arg4: memref<256x128xbf16, #tpu.memory_space<vmem>>, %arg5: memref<1x128xf32, #tpu.memory_space<vmem>>, %arg6: memref<128x512xbf16, #tpu.memory_space<vmem>>, %arg7: memref<1x512xf32, #tpu.memory_space<vmem>>, %arg8: memref<256x128xbf16, #tpu.memory_space<vmem>>, %arg9: memref<1x128xf32, #tpu.memory_space<vmem>>, %arg10: memref<8x256xf32, #tpu.memory_space<vmem>>, %arg11: memref<64x512xf32, #tpu.memory_space<vmem>>) attributes {dimension_semantics = [#tpu.dimension_semantics<arbitrary>], iteration_bounds = array<i64: 1>, scalar_prefetch = 0 : i64, scratch_operands = 1 : i64, tpu.core_type = #tpu.core_type<tc>, window_params = [{pipeline_mode = #tpu.pipeline_mode<synchronous>, transform_indices = @transform_0, window_bounds = array<i64: 8, 256>}, {pipeline_mode = #tpu.pipeline_mode<synchronous>, transform_indices = @transform_1, window_bounds = array<i64: 64, 1>}, {pipeline_mode = #tpu.pipeline_mode<synchronous>, transform_indices = @transform_2, window_bounds = array<i64: 128, 512>}, {pipeline_mode = #tpu.pipeline_mode<synchronous>, transform_indices = @transform_3, window_bounds = array<i64: 256, 128>}, {pipeline_mode = #tpu.pipeline_mode<synchronous>, transform_indices = @transform_4, window_bounds = array<i64: 1, 128>}, {pipeline_mode = #tpu.pipeline_mode<synchronous>, transform_indices = @transform_5, window_bounds = array<i64: 128, 512>}, {pipeline_mode = #tpu.pipeline_mode<synchronous>, transform_indices = @transform_6, window_bounds = array<i64: 1, 512>}, {pipeline_mode = #tpu.pipeline_mode<synchronous>, transform_indices = @transform_7, window_bounds = array<i64: 256, 128>}, {pipeline_mode = #tpu.pipeline_mode<synchronous>, transform_indices = @transform_8, window_bounds = array<i64: 1, 128>}, {pipeline_mode = #tpu.pipeline_mode<synchronous>, transform_indices = @transform_9, window_bounds = array<i64: 8, 256>}]} {
    %c0 = arith.constant 0 : index
    %c0_0 = arith.constant 0 : index
    %0 = vector.load %arg1[%c0, %c0_0] : memref<8x256xf32, #tpu.memory_space<vmem>>, vector<8x256xf32>
    %1 = arith.truncf %0 : vector<8x256xf32> to vector<8x256xbf16>
    %c0_1 = arith.constant 0 : index
    %c0_2 = arith.constant 0 : index
    %2 = vector.load %arg4[%c0_1, %c0_2] : memref<256x128xbf16, #tpu.memory_space<vmem>>, vector<256x128xbf16>
    %cst = arith.constant dense<0.000000e+00> : vector<8x128xf32>
    %3 = tpu.matmul %1, %2, %cst {dimension_numbers = #tpu.dot_dimension_numbers<[1], [0], [0], [1], [0, 0, 1, 1], [], []>} : vector<8x256xbf16>, vector<256x128xbf16>, vector<8x128xf32> -> vector<8x128xf32>
    %c0_3 = arith.constant 0 : index
    %c0_4 = arith.constant 0 : index
    %4 = vector.load %arg5[%c0_3, %c0_4] : memref<1x128xf32, #tpu.memory_space<vmem>>, vector<1x128xf32>
    %5 = vector.broadcast %4 : vector<1x128xf32> to vector<8x128xf32>
    %6 = arith.addf %3, %5 : vector<8x128xf32>
    %7 = math.tanh %6 : vector<8x128xf32>
    %c0_5 = arith.constant 0 : index
    %c0_6 = arith.constant 0 : index
    %8 = vector.load %arg10[%c0_5, %c0_6] : memref<8x256xf32, #tpu.memory_space<vmem>>, vector<8x128xf32>
    tpu.vector_store %arg10[%c0_5, %c0_6], %7 {strides = array<i32>} : memref<8x256xf32, #tpu.memory_space<vmem>>, vector<8x128xf32>,
    %c0_7 = arith.constant 0 : index
    %c0_8 = arith.constant 0 : index
    %9 = vector.load %arg2[%c0_7, %c0_8] : memref<64x1xi32, #tpu.memory_space<vmem>>, vector<64x1xi32>
    %10 = tpu.iota {dimensions = array<i32: 1>} : vector<64x128xi32>
    %11 = vector.broadcast %9 : vector<64x1xi32> to vector<64x128xi32>
    %12 = arith.cmpi eq, %11, %10 : vector<64x128xi32>
    %13 = arith.extui %12 : vector<64x128xi1> to vector<64x128xi32>
    %14 = arith.sitofp %13 : vector<64x128xi32> to vector<64x128xf32>
    %15 = arith.truncf %14 : vector<64x128xf32> to vector<64x128xbf16>
    %c0_9 = arith.constant 0 : index
    %c0_10 = arith.constant 0 : index
    %16 = vector.load %arg3[%c0_9, %c0_10] : memref<128x512xbf16, #tpu.memory_space<vmem>>, vector<128x512xbf16>
    %cst_11 = arith.constant dense<0.000000e+00> : vector<64x512xf32>
    %17 = tpu.matmul %15, %16, %cst_11 {dimension_numbers = #tpu.dot_dimension_numbers<[1], [0], [0], [1], [0, 0, 1, 1], [], []>} : vector<64x128xbf16>, vector<128x512xbf16>, vector<64x512xf32> -> vector<64x512xf32>
    %c0_12 = arith.constant 0 : index
    %c0_13 = arith.constant 0 : index
    %18 = vector.load %arg7[%c0_12, %c0_13] : memref<1x512xf32, #tpu.memory_space<vmem>>, vector<1x512xf32>
    %19 = vector.broadcast %18 : vector<1x512xf32> to vector<64x512xf32>
    %20 = arith.addf %17, %19 : vector<64x512xf32>
    %c0_14 = arith.constant 0 : index
    %c0_15 = arith.constant 0 : index
    %21 = vector.load %arg11[%c0_14, %c0_15] : memref<64x512xf32, #tpu.memory_space<vmem>>, vector<64x512xf32>
    tpu.vector_store %arg11[%c0_14, %c0_15], %20 {strides = array<i32>} : memref<64x512xf32, #tpu.memory_space<vmem>>, vector<64x512xf32>,
    %cst_16 = arith.constant 0.000000e+00 : bf16
    %22 = vector.broadcast %cst_16 : bf16 to vector<8x128xbf16>
    %cst_17 = arith.constant 0.000000e+00 : f32
    %23 = vector.broadcast %cst_17 : f32 to vector<8x128xf32>
    %c0_18 = arith.constant 0 : index
    %c0_19 = arith.constant 0 : index
    %24 = vector.load %arg11[%c0_18, %c0_19] : memref<64x512xf32, #tpu.memory_space<vmem>>, vector<8x512xf32>
    %c0_20 = arith.constant 0 : index
    %c0_21 = arith.constant 0 : index
    %25 = vector.load %arg6[%c0_20, %c0_21] : memref<128x512xbf16, #tpu.memory_space<vmem>>, vector<128x512xbf16>
    %cst_22 = arith.constant dense<0.000000e+00> : vector<8x512xf32>
    %26 = tpu.matmul %22, %25, %cst_22 {dimension_numbers = #tpu.dot_dimension_numbers<[1], [0], [0], [1], [0, 0, 1, 1], [], []>} : vector<8x128xbf16>, vector<128x512xbf16>, vector<8x512xf32> -> vector<8x512xf32>
    %27 = arith.addf %24, %26 : vector<8x512xf32>
    %28 = vector.extract_strided_slice %27 {offsets = [0, 0], sizes = [8, 128], strides = [1, 1]} : vector<8x512xf32> to vector<8x128xf32>
    %cst_23 = arith.constant 5.000000e-01 : f32
    %29 = vector.broadcast %cst_23 : f32 to vector<8x128xf32>
    %30 = arith.mulf %29, %28 : vector<8x128xf32>
    %31 = math.tanh %30 : vector<8x128xf32>
    %cst_24 = arith.constant 1.000000e+00 : f32
    %32 = vector.broadcast %cst_24 : f32 to vector<8x128xf32>
    %33 = arith.addf %31, %32 : vector<8x128xf32>
    %cst_25 = arith.constant 5.000000e-01 : f32
    %34 = vector.broadcast %cst_25 : f32 to vector<8x128xf32>
    %35 = arith.mulf %34, %33 : vector<8x128xf32>
    %36 = vector.extract_strided_slice %27 {offsets = [0, 128], sizes = [8, 128], strides = [1, 1]} : vector<8x512xf32> to vector<8x128xf32>
    %cst_26 = arith.constant 5.000000e-01 : f32
    %37 = vector.broadcast %cst_26 : f32 to vector<8x128xf32>
    %38 = arith.mulf %37, %36 : vector<8x128xf32>
    %39 = math.tanh %38 : vector<8x128xf32>
    %cst_27 = arith.constant 1.000000e+00 : f32
    %40 = vector.broadcast %cst_27 : f32 to vector<8x128xf32>
    %41 = arith.addf %39, %40 : vector<8x128xf32>
    %cst_28 = arith.constant 5.000000e-01 : f32
    %42 = vector.broadcast %cst_28 : f32 to vector<8x128xf32>
    %43 = arith.mulf %42, %41 : vector<8x128xf32>
    %44 = vector.extract_strided_slice %27 {offsets = [0, 256], sizes = [8, 128], strides = [1, 1]} : vector<8x512xf32> to vector<8x128xf32>
    %45 = math.tanh %44 : vector<8x128xf32>
    %46 = vector.extract_strided_slice %27 {offsets = [0, 384], sizes = [8, 128], strides = [1, 1]} : vector<8x512xf32> to vector<8x128xf32>
    %cst_29 = arith.constant 5.000000e-01 : f32
    %47 = vector.broadcast %cst_29 : f32 to vector<8x128xf32>
    %48 = arith.mulf %47, %46 : vector<8x128xf32>
    %49 = math.tanh %48 : vector<8x128xf32>
    %cst_30 = arith.constant 1.000000e+00 : f32
    %50 = vector.broadcast %cst_30 : f32 to vector<8x128xf32>
    %51 = arith.addf %49, %50 : vector<8x128xf32>
    %cst_31 = arith.constant 5.000000e-01 : f32
    %52 = vector.broadcast %cst_31 : f32 to vector<8x128xf32>
    %53 = arith.mulf %52, %51 : vector<8x128xf32>
    %54 = arith.mulf %43, %23 : vector<8x128xf32>
    %55 = arith.mulf %35, %45 : vector<8x128xf32>
    %56 = arith.addf %54, %55 : vector<8x128xf32>
    %57 = math.tanh %56 : vector<8x128xf32>
    %58 = arith.mulf %53, %57 : vector<8x128xf32>
    %59 = arith.truncf %58 : vector<8x128xf32> to vector<8x128xbf16>
    %c8 = arith.constant 8 : index
    %c0_32 = arith.constant 0 : index
    %60 = vector.load %arg11[%c8, %c0_32] : memref<64x512xf32, #tpu.memory_space<vmem>>, vector<8x512xf32>
    %c0_33 = arith.constant 0 : index
    %c0_34 = arith.constant 0 : index
    %61 = vector.load %arg6[%c0_33, %c0_34] : memref<128x512xbf16, #tpu.memory_space<vmem>>, vector<128x512xbf16>
    %cst_35 = arith.constant dense<0.000000e+00> : vector<8x512xf32>
    %62 = tpu.matmul %59, %61, %cst_35 {dimension_numbers = #tpu.dot_dimension_numbers<[1], [0], [0], [1], [0, 0, 1, 1], [], []>} : vector<8x128xbf16>, vector<128x512xbf16>, vector<8x512xf32> -> vector<8x512xf32>
    %63 = arith.addf %60, %62 : vector<8x512xf32>
    %64 = vector.extract_strided_slice %63 {offsets = [0, 0], sizes = [8, 128], strides = [1, 1]} : vector<8x512xf32> to vector<8x128xf32>
    %cst_36 = arith.constant 5.000000e-01 : f32
    %65 = vector.broadcast %cst_36 : f32 to vector<8x128xf32>
    %66 = arith.mulf %65, %64 : vector<8x128xf32>
    %67 = math.tanh %66 : vector<8x128xf32>
    %cst_37 = arith.constant 1.000000e+00 : f32
    %68 = vector.broadcast %cst_37 : f32 to vector<8x128xf32>
    %69 = arith.addf %67, %68 : vector<8x128xf32>
    %cst_38 = arith.constant 5.000000e-01 : f32
    %70 = vector.broadcast %cst_38 : f32 to vector<8x128xf32>
    %71 = arith.mulf %70, %69 : vector<8x128xf32>
    %72 = vector.extract_strided_slice %63 {offsets = [0, 128], sizes = [8, 128], strides = [1, 1]} : vector<8x512xf32> to vector<8x128xf32>
    %cst_39 = arith.constant 5.000000e-01 : f32
    %73 = vector.broadcast %cst_39 : f32 to vector<8x128xf32>
    %74 = arith.mulf %73, %72 : vector<8x128xf32>
    %75 = math.tanh %74 : vector<8x128xf32>
    %cst_40 = arith.constant 1.000000e+00 : f32
    %76 = vector.broadcast %cst_40 : f32 to vector<8x128xf32>
    %77 = arith.addf %75, %76 : vector<8x128xf32>
    %cst_41 = arith.constant 5.000000e-01 : f32
    %78 = vector.broadcast %cst_41 : f32 to vector<8x128xf32>
    %79 = arith.mulf %78, %77 : vector<8x128xf32>
    %80 = vector.extract_strided_slice %63 {offsets = [0, 256], sizes = [8, 128], strides = [1, 1]} : vector<8x512xf32> to vector<8x128xf32>
    %81 = math.tanh %80 : vector<8x128xf32>
    %82 = vector.extract_strided_slice %63 {offsets = [0, 384], sizes = [8, 128], strides = [1, 1]} : vector<8x512xf32> to vector<8x128xf32>
    %cst_42 = arith.constant 5.000000e-01 : f32
    %83 = vector.broadcast %cst_42 : f32 to vector<8x128xf32>
    %84 = arith.mulf %83, %82 : vector<8x128xf32>
    %85 = math.tanh %84 : vector<8x128xf32>
    %cst_43 = arith.constant 1.000000e+00 : f32
    %86 = vector.broadcast %cst_43 : f32 to vector<8x128xf32>
    %87 = arith.addf %85, %86 : vector<8x128xf32>
    %cst_44 = arith.constant 5.000000e-01 : f32
    %88 = vector.broadcast %cst_44 : f32 to vector<8x128xf32>
    %89 = arith.mulf %88, %87 : vector<8x128xf32>
    %90 = arith.mulf %79, %56 : vector<8x128xf32>
    %91 = arith.mulf %71, %81 : vector<8x128xf32>
    %92 = arith.addf %90, %91 : vector<8x128xf32>
    %93 = math.tanh %92 : vector<8x128xf32>
    %94 = arith.mulf %89, %93 : vector<8x128xf32>
    %95 = arith.truncf %94 : vector<8x128xf32> to vector<8x128xbf16>
    %c16 = arith.constant 16 : index
    %c0_45 = arith.constant 0 : index
    %96 = vector.load %arg11[%c16, %c0_45] : memref<64x512xf32, #tpu.memory_space<vmem>>, vector<8x512xf32>
    %c0_46 = arith.constant 0 : index
    %c0_47 = arith.constant 0 : index
    %97 = vector.load %arg6[%c0_46, %c0_47] : memref<128x512xbf16, #tpu.memory_space<vmem>>, vector<128x512xbf16>
    %cst_48 = arith.constant dense<0.000000e+00> : vector<8x512xf32>
    %98 = tpu.matmul %95, %97, %cst_48 {dimension_numbers = #tpu.dot_dimension_numbers<[1], [0], [0], [1], [0, 0, 1, 1], [], []>} : vector<8x128xbf16>, vector<128x512xbf16>, vector<8x512xf32> -> vector<8x512xf32>
    %99 = arith.addf %96, %98 : vector<8x512xf32>
    %100 = vector.extract_strided_slice %99 {offsets = [0, 0], sizes = [8, 128], strides = [1, 1]} : vector<8x512xf32> to vector<8x128xf32>
    %cst_49 = arith.constant 5.000000e-01 : f32
    %101 = vector.broadcast %cst_49 : f32 to vector<8x128xf32>
    %102 = arith.mulf %101, %100 : vector<8x128xf32>
    %103 = math.tanh %102 : vector<8x128xf32>
    %cst_50 = arith.constant 1.000000e+00 : f32
    %104 = vector.broadcast %cst_50 : f32 to vector<8x128xf32>
    %105 = arith.addf %103, %104 : vector<8x128xf32>
    %cst_51 = arith.constant 5.000000e-01 : f32
    %106 = vector.broadcast %cst_51 : f32 to vector<8x128xf32>
    %107 = arith.mulf %106, %105 : vector<8x128xf32>
    %108 = vector.extract_strided_slice %99 {offsets = [0, 128], sizes = [8, 128], strides = [1, 1]} : vector<8x512xf32> to vector<8x128xf32>
    %cst_52 = arith.constant 5.000000e-01 : f32
    %109 = vector.broadcast %cst_52 : f32 to vector<8x128xf32>
    %110 = arith.mulf %109, %108 : vector<8x128xf32>
    %111 = math.tanh %110 : vector<8x128xf32>
    %cst_53 = arith.constant 1.000000e+00 : f32
    %112 = vector.broadcast %cst_53 : f32 to vector<8x128xf32>
    %113 = arith.addf %111, %112 : vector<8x128xf32>
    %cst_54 = arith.constant 5.000000e-01 : f32
    %114 = vector.broadcast %cst_54 : f32 to vector<8x128xf32>
    %115 = arith.mulf %114, %113 : vector<8x128xf32>
    %116 = vector.extract_strided_slice %99 {offsets = [0, 256], sizes = [8, 128], strides = [1, 1]} : vector<8x512xf32> to vector<8x128xf32>
    %117 = math.tanh %116 : vector<8x128xf32>
    %118 = vector.extract_strided_slice %99 {offsets = [0, 384], sizes = [8, 128], strides = [1, 1]} : vector<8x512xf32> to vector<8x128xf32>
    %cst_55 = arith.constant 5.000000e-01 : f32
    %119 = vector.broadcast %cst_55 : f32 to vector<8x128xf32>
    %120 = arith.mulf %119, %118 : vector<8x128xf32>
    %121 = math.tanh %120 : vector<8x128xf32>
    %cst_56 = arith.constant 1.000000e+00 : f32
    %122 = vector.broadcast %cst_56 : f32 to vector<8x128xf32>
    %123 = arith.addf %121, %122 : vector<8x128xf32>
    %cst_57 = arith.constant 5.000000e-01 : f32
    %124 = vector.broadcast %cst_57 : f32 to vector<8x128xf32>
    %125 = arith.mulf %124, %123 : vector<8x128xf32>
    %126 = arith.mulf %115, %92 : vector<8x128xf32>
    %127 = arith.mulf %107, %117 : vector<8x128xf32>
    %128 = arith.addf %126, %127 : vector<8x128xf32>
    %129 = math.tanh %128 : vector<8x128xf32>
    %130 = arith.mulf %125, %129 : vector<8x128xf32>
    %131 = arith.truncf %130 : vector<8x128xf32> to vector<8x128xbf16>
    %c24 = arith.constant 24 : index
    %c0_58 = arith.constant 0 : index
    %132 = vector.load %arg11[%c24, %c0_58] : memref<64x512xf32, #tpu.memory_space<vmem>>, vector<8x512xf32>
    %c0_59 = arith.constant 0 : index
    %c0_60 = arith.constant 0 : index
    %133 = vector.load %arg6[%c0_59, %c0_60] : memref<128x512xbf16, #tpu.memory_space<vmem>>, vector<128x512xbf16>
    %cst_61 = arith.constant dense<0.000000e+00> : vector<8x512xf32>
    %134 = tpu.matmul %131, %133, %cst_61 {dimension_numbers = #tpu.dot_dimension_numbers<[1], [0], [0], [1], [0, 0, 1, 1], [], []>} : vector<8x128xbf16>, vector<128x512xbf16>, vector<8x512xf32> -> vector<8x512xf32>
    %135 = arith.addf %132, %134 : vector<8x512xf32>
    %136 = vector.extract_strided_slice %135 {offsets = [0, 0], sizes = [8, 128], strides = [1, 1]} : vector<8x512xf32> to vector<8x128xf32>
    %cst_62 = arith.constant 5.000000e-01 : f32
    %137 = vector.broadcast %cst_62 : f32 to vector<8x128xf32>
    %138 = arith.mulf %137, %136 : vector<8x128xf32>
    %139 = math.tanh %138 : vector<8x128xf32>
    %cst_63 = arith.constant 1.000000e+00 : f32
    %140 = vector.broadcast %cst_63 : f32 to vector<8x128xf32>
    %141 = arith.addf %139, %140 : vector<8x128xf32>
    %cst_64 = arith.constant 5.000000e-01 : f32
    %142 = vector.broadcast %cst_64 : f32 to vector<8x128xf32>
    %143 = arith.mulf %142, %141 : vector<8x128xf32>
    %144 = vector.extract_strided_slice %135 {offsets = [0, 128], sizes = [8, 128], strides = [1, 1]} : vector<8x512xf32> to vector<8x128xf32>
    %cst_65 = arith.constant 5.000000e-01 : f32
    %145 = vector.broadcast %cst_65 : f32 to vector<8x128xf32>
    %146 = arith.mulf %145, %144 : vector<8x128xf32>
    %147 = math.tanh %146 : vector<8x128xf32>
    %cst_66 = arith.constant 1.000000e+00 : f32
    %148 = vector.broadcast %cst_66 : f32 to vector<8x128xf32>
    %149 = arith.addf %147, %148 : vector<8x128xf32>
    %cst_67 = arith.constant 5.000000e-01 : f32
    %150 = vector.broadcast %cst_67 : f32 to vector<8x128xf32>
    %151 = arith.mulf %150, %149 : vector<8x128xf32>
    %152 = vector.extract_strided_slice %135 {offsets = [0, 256], sizes = [8, 128], strides = [1, 1]} : vector<8x512xf32> to vector<8x128xf32>
    %153 = math.tanh %152 : vector<8x128xf32>
    %154 = vector.extract_strided_slice %135 {offsets = [0, 384], sizes = [8, 128], strides = [1, 1]} : vector<8x512xf32> to vector<8x128xf32>
    %cst_68 = arith.constant 5.000000e-01 : f32
    %155 = vector.broadcast %cst_68 : f32 to vector<8x128xf32>
    %156 = arith.mulf %155, %154 : vector<8x128xf32>
    %157 = math.tanh %156 : vector<8x128xf32>
    %cst_69 = arith.constant 1.000000e+00 : f32
    %158 = vector.broadcast %cst_69 : f32 to vector<8x128xf32>
    %159 = arith.addf %157, %158 : vector<8x128xf32>
    %cst_70 = arith.constant 5.000000e-01 : f32
    %160 = vector.broadcast %cst_70 : f32 to vector<8x128xf32>
    %161 = arith.mulf %160, %159 : vector<8x128xf32>
    %162 = arith.mulf %151, %128 : vector<8x128xf32>
    %163 = arith.mulf %143, %153 : vector<8x128xf32>
    %164 = arith.addf %162, %163 : vector<8x128xf32>
    %165 = math.tanh %164 : vector<8x128xf32>
    %166 = arith.mulf %161, %165 : vector<8x128xf32>
    %167 = arith.truncf %166 : vector<8x128xf32> to vector<8x128xbf16>
    %c32 = arith.constant 32 : index
    %c0_71 = arith.constant 0 : index
    %168 = vector.load %arg11[%c32, %c0_71] : memref<64x512xf32, #tpu.memory_space<vmem>>, vector<8x512xf32>
    %c0_72 = arith.constant 0 : index
    %c0_73 = arith.constant 0 : index
    %169 = vector.load %arg6[%c0_72, %c0_73] : memref<128x512xbf16, #tpu.memory_space<vmem>>, vector<128x512xbf16>
    %cst_74 = arith.constant dense<0.000000e+00> : vector<8x512xf32>
    %170 = tpu.matmul %167, %169, %cst_74 {dimension_numbers = #tpu.dot_dimension_numbers<[1], [0], [0], [1], [0, 0, 1, 1], [], []>} : vector<8x128xbf16>, vector<128x512xbf16>, vector<8x512xf32> -> vector<8x512xf32>
    %171 = arith.addf %168, %170 : vector<8x512xf32>
    %172 = vector.extract_strided_slice %171 {offsets = [0, 0], sizes = [8, 128], strides = [1, 1]} : vector<8x512xf32> to vector<8x128xf32>
    %cst_75 = arith.constant 5.000000e-01 : f32
    %173 = vector.broadcast %cst_75 : f32 to vector<8x128xf32>
    %174 = arith.mulf %173, %172 : vector<8x128xf32>
    %175 = math.tanh %174 : vector<8x128xf32>
    %cst_76 = arith.constant 1.000000e+00 : f32
    %176 = vector.broadcast %cst_76 : f32 to vector<8x128xf32>
    %177 = arith.addf %175, %176 : vector<8x128xf32>
    %cst_77 = arith.constant 5.000000e-01 : f32
    %178 = vector.broadcast %cst_77 : f32 to vector<8x128xf32>
    %179 = arith.mulf %178, %177 : vector<8x128xf32>
    %180 = vector.extract_strided_slice %171 {offsets = [0, 128], sizes = [8, 128], strides = [1, 1]} : vector<8x512xf32> to vector<8x128xf32>
    %cst_78 = arith.constant 5.000000e-01 : f32
    %181 = vector.broadcast %cst_78 : f32 to vector<8x128xf32>
    %182 = arith.mulf %181, %180 : vector<8x128xf32>
    %183 = math.tanh %182 : vector<8x128xf32>
    %cst_79 = arith.constant 1.000000e+00 : f32
    %184 = vector.broadcast %cst_79 : f32 to vector<8x128xf32>
    %185 = arith.addf %183, %184 : vector<8x128xf32>
    %cst_80 = arith.constant 5.000000e-01 : f32
    %186 = vector.broadcast %cst_80 : f32 to vector<8x128xf32>
    %187 = arith.mulf %186, %185 : vector<8x128xf32>
    %188 = vector.extract_strided_slice %171 {offsets = [0, 256], sizes = [8, 128], strides = [1, 1]} : vector<8x512xf32> to vector<8x128xf32>
    %189 = math.tanh %188 : vector<8x128xf32>
    %190 = vector.extract_strided_slice %171 {offsets = [0, 384], sizes = [8, 128], strides = [1, 1]} : vector<8x512xf32> to vector<8x128xf32>
    %cst_81 = arith.constant 5.000000e-01 : f32
    %191 = vector.broadcast %cst_81 : f32 to vector<8x128xf32>
    %192 = arith.mulf %191, %190 : vector<8x128xf32>
    %193 = math.tanh %192 : vector<8x128xf32>
    %cst_82 = arith.constant 1.000000e+00 : f32
    %194 = vector.broadcast %cst_82 : f32 to vector<8x128xf32>
    %195 = arith.addf %193, %194 : vector<8x128xf32>
    %cst_83 = arith.constant 5.000000e-01 : f32
    %196 = vector.broadcast %cst_83 : f32 to vector<8x128xf32>
    %197 = arith.mulf %196, %195 : vector<8x128xf32>
    %198 = arith.mulf %187, %164 : vector<8x128xf32>
    %199 = arith.mulf %179, %189 : vector<8x128xf32>
    %200 = arith.addf %198, %199 : vector<8x128xf32>
    %201 = math.tanh %200 : vector<8x128xf32>
    %202 = arith.mulf %197, %201 : vector<8x128xf32>
    %203 = arith.truncf %202 : vector<8x128xf32> to vector<8x128xbf16>
    %c40 = arith.constant 40 : index
    %c0_84 = arith.constant 0 : index
    %204 = vector.load %arg11[%c40, %c0_84] : memref<64x512xf32, #tpu.memory_space<vmem>>, vector<8x512xf32>
    %c0_85 = arith.constant 0 : index
    %c0_86 = arith.constant 0 : index
    %205 = vector.load %arg6[%c0_85, %c0_86] : memref<128x512xbf16, #tpu.memory_space<vmem>>, vector<128x512xbf16>
    %cst_87 = arith.constant dense<0.000000e+00> : vector<8x512xf32>
    %206 = tpu.matmul %203, %205, %cst_87 {dimension_numbers = #tpu.dot_dimension_numbers<[1], [0], [0], [1], [0, 0, 1, 1], [], []>} : vector<8x128xbf16>, vector<128x512xbf16>, vector<8x512xf32> -> vector<8x512xf32>
    %207 = arith.addf %204, %206 : vector<8x512xf32>
    %208 = vector.extract_strided_slice %207 {offsets = [0, 0], sizes = [8, 128], strides = [1, 1]} : vector<8x512xf32> to vector<8x128xf32>
    %cst_88 = arith.constant 5.000000e-01 : f32
    %209 = vector.broadcast %cst_88 : f32 to vector<8x128xf32>
    %210 = arith.mulf %209, %208 : vector<8x128xf32>
    %211 = math.tanh %210 : vector<8x128xf32>
    %cst_89 = arith.constant 1.000000e+00 : f32
    %212 = vector.broadcast %cst_89 : f32 to vector<8x128xf32>
    %213 = arith.addf %211, %212 : vector<8x128xf32>
    %cst_90 = arith.constant 5.000000e-01 : f32
    %214 = vector.broadcast %cst_90 : f32 to vector<8x128xf32>
    %215 = arith.mulf %214, %213 : vector<8x128xf32>
    %216 = vector.extract_strided_slice %207 {offsets = [0, 128], sizes = [8, 128], strides = [1, 1]} : vector<8x512xf32> to vector<8x128xf32>
    %cst_91 = arith.constant 5.000000e-01 : f32
    %217 = vector.broadcast %cst_91 : f32 to vector<8x128xf32>
    %218 = arith.mulf %217, %216 : vector<8x128xf32>
    %219 = math.tanh %218 : vector<8x128xf32>
    %cst_92 = arith.constant 1.000000e+00 : f32
    %220 = vector.broadcast %cst_92 : f32 to vector<8x128xf32>
    %221 = arith.addf %219, %220 : vector<8x128xf32>
    %cst_93 = arith.constant 5.000000e-01 : f32
    %222 = vector.broadcast %cst_93 : f32 to vector<8x128xf32>
    %223 = arith.mulf %222, %221 : vector<8x128xf32>
    %224 = vector.extract_strided_slice %207 {offsets = [0, 256], sizes = [8, 128], strides = [1, 1]} : vector<8x512xf32> to vector<8x128xf32>
    %225 = math.tanh %224 : vector<8x128xf32>
    %226 = vector.extract_strided_slice %207 {offsets = [0, 384], sizes = [8, 128], strides = [1, 1]} : vector<8x512xf32> to vector<8x128xf32>
    %cst_94 = arith.constant 5.000000e-01 : f32
    %227 = vector.broadcast %cst_94 : f32 to vector<8x128xf32>
    %228 = arith.mulf %227, %226 : vector<8x128xf32>
    %229 = math.tanh %228 : vector<8x128xf32>
    %cst_95 = arith.constant 1.000000e+00 : f32
    %230 = vector.broadcast %cst_95 : f32 to vector<8x128xf32>
    %231 = arith.addf %229, %230 : vector<8x128xf32>
    %cst_96 = arith.constant 5.000000e-01 : f32
    %232 = vector.broadcast %cst_96 : f32 to vector<8x128xf32>
    %233 = arith.mulf %232, %231 : vector<8x128xf32>
    %234 = arith.mulf %223, %200 : vector<8x128xf32>
    %235 = arith.mulf %215, %225 : vector<8x128xf32>
    %236 = arith.addf %234, %235 : vector<8x128xf32>
    %237 = math.tanh %236 : vector<8x128xf32>
    %238 = arith.mulf %233, %237 : vector<8x128xf32>
    %239 = arith.truncf %238 : vector<8x128xf32> to vector<8x128xbf16>
    %c48 = arith.constant 48 : index
    %c0_97 = arith.constant 0 : index
    %240 = vector.load %arg11[%c48, %c0_97] : memref<64x512xf32, #tpu.memory_space<vmem>>, vector<8x512xf32>
    %c0_98 = arith.constant 0 : index
    %c0_99 = arith.constant 0 : index
    %241 = vector.load %arg6[%c0_98, %c0_99] : memref<128x512xbf16, #tpu.memory_space<vmem>>, vector<128x512xbf16>
    %cst_100 = arith.constant dense<0.000000e+00> : vector<8x512xf32>
    %242 = tpu.matmul %239, %241, %cst_100 {dimension_numbers = #tpu.dot_dimension_numbers<[1], [0], [0], [1], [0, 0, 1, 1], [], []>} : vector<8x128xbf16>, vector<128x512xbf16>, vector<8x512xf32> -> vector<8x512xf32>
    %243 = arith.addf %240, %242 : vector<8x512xf32>
    %244 = vector.extract_strided_slice %243 {offsets = [0, 0], sizes = [8, 128], strides = [1, 1]} : vector<8x512xf32> to vector<8x128xf32>
    %cst_101 = arith.constant 5.000000e-01 : f32
    %245 = vector.broadcast %cst_101 : f32 to vector<8x128xf32>
    %246 = arith.mulf %245, %244 : vector<8x128xf32>
    %247 = math.tanh %246 : vector<8x128xf32>
    %cst_102 = arith.constant 1.000000e+00 : f32
    %248 = vector.broadcast %cst_102 : f32 to vector<8x128xf32>
    %249 = arith.addf %247, %248 : vector<8x128xf32>
    %cst_103 = arith.constant 5.000000e-01 : f32
    %250 = vector.broadcast %cst_103 : f32 to vector<8x128xf32>
    %251 = arith.mulf %250, %249 : vector<8x128xf32>
    %252 = vector.extract_strided_slice %243 {offsets = [0, 128], sizes = [8, 128], strides = [1, 1]} : vector<8x512xf32> to vector<8x128xf32>
    %cst_104 = arith.constant 5.000000e-01 : f32
    %253 = vector.broadcast %cst_104 : f32 to vector<8x128xf32>
    %254 = arith.mulf %253, %252 : vector<8x128xf32>
    %255 = math.tanh %254 : vector<8x128xf32>
    %cst_105 = arith.constant 1.000000e+00 : f32
    %256 = vector.broadcast %cst_105 : f32 to vector<8x128xf32>
    %257 = arith.addf %255, %256 : vector<8x128xf32>
    %cst_106 = arith.constant 5.000000e-01 : f32
    %258 = vector.broadcast %cst_106 : f32 to vector<8x128xf32>
    %259 = arith.mulf %258, %257 : vector<8x128xf32>
    %260 = vector.extract_strided_slice %243 {offsets = [0, 256], sizes = [8, 128], strides = [1, 1]} : vector<8x512xf32> to vector<8x128xf32>
    %261 = math.tanh %260 : vector<8x128xf32>
    %262 = vector.extract_strided_slice %243 {offsets = [0, 384], sizes = [8, 128], strides = [1, 1]} : vector<8x512xf32> to vector<8x128xf32>
    %cst_107 = arith.constant 5.000000e-01 : f32
    %263 = vector.broadcast %cst_107 : f32 to vector<8x128xf32>
    %264 = arith.mulf %263, %262 : vector<8x128xf32>
    %265 = math.tanh %264 : vector<8x128xf32>
    %cst_108 = arith.constant 1.000000e+00 : f32
    %266 = vector.broadcast %cst_108 : f32 to vector<8x128xf32>
    %267 = arith.addf %265, %266 : vector<8x128xf32>
    %cst_109 = arith.constant 5.000000e-01 : f32
    %268 = vector.broadcast %cst_109 : f32 to vector<8x128xf32>
    %269 = arith.mulf %268, %267 : vector<8x128xf32>
    %270 = arith.mulf %259, %236 : vector<8x128xf32>
    %271 = arith.mulf %251, %261 : vector<8x128xf32>
    %272 = arith.addf %270, %271 : vector<8x128xf32>
    %273 = math.tanh %272 : vector<8x128xf32>
    %274 = arith.mulf %269, %273 : vector<8x128xf32>
    %275 = arith.truncf %274 : vector<8x128xf32> to vector<8x128xbf16>
    %c56 = arith.constant 56 : index
    %c0_110 = arith.constant 0 : index
    %276 = vector.load %arg11[%c56, %c0_110] : memref<64x512xf32, #tpu.memory_space<vmem>>, vector<8x512xf32>
    %c0_111 = arith.constant 0 : index
    %c0_112 = arith.constant 0 : index
    %277 = vector.load %arg6[%c0_111, %c0_112] : memref<128x512xbf16, #tpu.memory_space<vmem>>, vector<128x512xbf16>
    %cst_113 = arith.constant dense<0.000000e+00> : vector<8x512xf32>
    %278 = tpu.matmul %275, %277, %cst_113 {dimension_numbers = #tpu.dot_dimension_numbers<[1], [0], [0], [1], [0, 0, 1, 1], [], []>} : vector<8x128xbf16>, vector<128x512xbf16>, vector<8x512xf32> -> vector<8x512xf32>
    %279 = arith.addf %276, %278 : vector<8x512xf32>
    %280 = vector.extract_strided_slice %279 {offsets = [0, 0], sizes = [8, 128], strides = [1, 1]} : vector<8x512xf32> to vector<8x128xf32>
    %cst_114 = arith.constant 5.000000e-01 : f32
    %281 = vector.broadcast %cst_114 : f32 to vector<8x128xf32>
    %282 = arith.mulf %281, %280 : vector<8x128xf32>
    %283 = math.tanh %282 : vector<8x128xf32>
    %cst_115 = arith.constant 1.000000e+00 : f32
    %284 = vector.broadcast %cst_115 : f32 to vector<8x128xf32>
    %285 = arith.addf %283, %284 : vector<8x128xf32>
    %cst_116 = arith.constant 5.000000e-01 : f32
    %286 = vector.broadcast %cst_116 : f32 to vector<8x128xf32>
    %287 = arith.mulf %286, %285 : vector<8x128xf32>
    %288 = vector.extract_strided_slice %279 {offsets = [0, 128], sizes = [8, 128], strides = [1, 1]} : vector<8x512xf32> to vector<8x128xf32>
    %cst_117 = arith.constant 5.000000e-01 : f32
    %289 = vector.broadcast %cst_117 : f32 to vector<8x128xf32>
    %290 = arith.mulf %289, %288 : vector<8x128xf32>
    %291 = math.tanh %290 : vector<8x128xf32>
    %cst_118 = arith.constant 1.000000e+00 : f32
    %292 = vector.broadcast %cst_118 : f32 to vector<8x128xf32>
    %293 = arith.addf %291, %292 : vector<8x128xf32>
    %cst_119 = arith.constant 5.000000e-01 : f32
    %294 = vector.broadcast %cst_119 : f32 to vector<8x128xf32>
    %295 = arith.mulf %294, %293 : vector<8x128xf32>
    %296 = vector.extract_strided_slice %279 {offsets = [0, 256], sizes = [8, 128], strides = [1, 1]} : vector<8x512xf32> to vector<8x128xf32>
    %297 = math.tanh %296 : vector<8x128xf32>
    %298 = vector.extract_strided_slice %279 {offsets = [0, 384], sizes = [8, 128], strides = [1, 1]} : vector<8x512xf32> to vector<8x128xf32>
    %cst_120 = arith.constant 5.000000e-01 : f32
    %299 = vector.broadcast %cst_120 : f32 to vector<8x128xf32>
    %300 = arith.mulf %299, %298 : vector<8x128xf32>
    %301 = math.tanh %300 : vector<8x128xf32>
    %cst_121 = arith.constant 1.000000e+00 : f32
    %302 = vector.broadcast %cst_121 : f32 to vector<8x128xf32>
    %303 = arith.addf %301, %302 : vector<8x128xf32>
    %cst_122 = arith.constant 5.000000e-01 : f32
    %304 = vector.broadcast %cst_122 : f32 to vector<8x128xf32>
    %305 = arith.mulf %304, %303 : vector<8x128xf32>
    %306 = arith.mulf %295, %272 : vector<8x128xf32>
    %307 = arith.mulf %287, %297 : vector<8x128xf32>
    %308 = arith.addf %306, %307 : vector<8x128xf32>
    %309 = math.tanh %308 : vector<8x128xf32>
    %310 = arith.mulf %305, %309 : vector<8x128xf32>
    %311 = arith.truncf %310 : vector<8x128xf32> to vector<8x128xbf16>
    %312 = arith.truncf %308 : vector<8x128xf32> to vector<8x128xbf16>
    %313 = tpu.concatenate %311, %312 in 1 : vector<8x128xbf16>, vector<8x128xbf16> -> vector<8x256xbf16>
    %c0_123 = arith.constant 0 : index
    %c0_124 = arith.constant 0 : index
    %314 = vector.load %arg8[%c0_123, %c0_124] : memref<256x128xbf16, #tpu.memory_space<vmem>>, vector<256x128xbf16>
    %cst_125 = arith.constant dense<0.000000e+00> : vector<8x128xf32>
    %315 = tpu.matmul %313, %314, %cst_125 {dimension_numbers = #tpu.dot_dimension_numbers<[1], [0], [0], [1], [0, 0, 1, 1], [], []>} : vector<8x256xbf16>, vector<256x128xbf16>, vector<8x128xf32> -> vector<8x128xf32>
    %c0_126 = arith.constant 0 : index
    %c0_127 = arith.constant 0 : index
    %316 = vector.load %arg9[%c0_126, %c0_127] : memref<1x128xf32, #tpu.memory_space<vmem>>, vector<1x128xf32>
    %317 = vector.broadcast %316 : vector<1x128xf32> to vector<8x128xf32>
    %318 = arith.addf %315, %317 : vector<8x128xf32>
    %319 = math.tanh %318 : vector<8x128xf32>
    %c0_128 = arith.constant 0 : index
    %c128 = arith.constant 128 : index
    %320 = vector.load %arg10[%c0_128, %c128] : memref<8x256xf32, #tpu.memory_space<vmem>>, vector<8x128xf32>
    tpu.vector_store %arg10[%c0_128, %c128], %319 {strides = array<i32>} : memref<8x256xf32, #tpu.memory_space<vmem>>, vector<8x128xf32>,
    return
  }
  func.func @transform_0(%arg0: i32) -> (i32, i32) {
    %c0_i32 = arith.constant 0 : i32
    %c0_i32_0 = arith.constant 0 : i32
    %c0_i32_1 = arith.constant 0 : i32
    return %c0_i32, %c0_i32_0 : i32, i32
  }
  func.func @transform_1(%arg0: i32) -> (i32, i32) {
    %c0_i32 = arith.constant 0 : i32
    %c0_i32_0 = arith.constant 0 : i32
    %c0_i32_1 = arith.constant 0 : i32
    return %c0_i32, %c0_i32_0 : i32, i32
  }
  func.func @transform_2(%arg0: i32) -> (i32, i32) {
    %c0_i32 = arith.constant 0 : i32
    %c0_i32_0 = arith.constant 0 : i32
    %c0_i32_1 = arith.constant 0 : i32
    return %c0_i32, %c0_i32_0 : i32, i32
  }
  func.func @transform_3(%arg0: i32) -> (i32, i32) {
    %c0_i32 = arith.constant 0 : i32
    %c0_i32_0 = arith.constant 0 : i32
    %c0_i32_1 = arith.constant 0 : i32
    return %c0_i32, %c0_i32_0 : i32, i32
  }
  func.func @transform_4(%arg0: i32) -> (i32, i32) {
    %c0_i32 = arith.constant 0 : i32
    %c0_i32_0 = arith.constant 0 : i32
    %c0_i32_1 = arith.constant 0 : i32
    return %c0_i32, %c0_i32_0 : i32, i32
  }
  func.func @transform_5(%arg0: i32) -> (i32, i32) {
    %c0_i32 = arith.constant 0 : i32
    %c0_i32_0 = arith.constant 0 : i32
    %c0_i32_1 = arith.constant 0 : i32
    return %c0_i32, %c0_i32_0 : i32, i32
  }
  func.func @transform_6(%arg0: i32) -> (i32, i32) {
    %c0_i32 = arith.constant 0 : i32
    %c0_i32_0 = arith.constant 0 : i32
    %c0_i32_1 = arith.constant 0 : i32
    return %c0_i32, %c0_i32_0 : i32, i32
  }
  func.func @transform_7(%arg0: i32) -> (i32, i32) {
    %c0_i32 = arith.constant 0 : i32
    %c0_i32_0 = arith.constant 0 : i32
    %c0_i32_1 = arith.constant 0 : i32
    return %c0_i32, %c0_i32_0 : i32, i32
  }
  func.func @transform_8(%arg0: i32) -> (i32, i32) {
    %c0_i32 = arith.constant 0 : i32
    %c0_i32_0 = arith.constant 0 : i32
    %c0_i32_1 = arith.constant 0 : i32
    return %c0_i32, %c0_i32_0 : i32, i32
  }
  func.func @transform_9(%arg0: i32) -> (i32, i32) {
    %c0_i32 = arith.constant 0 : i32
    %c0_i32_0 = arith.constant 0 : i32
    %c0_i32_1 = arith.constant 0 : i32
    return %c0_i32, %c0_i32_0 : i32, i32
  }
}

</mosaic_0001>

<bundles_post_ra>
// kernel: tpu_custom_call.1
= control target key start
LH: loop header
LB: loop body
LE: loop exit
PB: predicated region body
PF: predicated region fallthrough
CT: control target
= control target key end

     0   :  { %14 = vsyncpa [#allocation4], 0  ;;  %s3231_s0 = inlined_call_operand.vmem [shape: f32[8,256], index: 0, kind: input, shape index: {}]   ;;  %s3232_s1 = inlined_call_operand.vmem [shape: s32[64,1], index: 1, kind: input, shape index: {}]   ;;  %s3233_s2 = inlined_call_operand.hbm [shape: bf16[128,512], index: 2, kind: input, shape index: {}]   ;;  %s3234_s3 = inlined_call_operand.hbm [shape: bf16[256,128], index: 3, kind: input, shape index: {}]   ;;  %s3235_s4 = inlined_call_operand.vmem [shape: f32[1,128], index: 4, kind: input, shape index: {}]   ;;  %s3236_s5 = inlined_call_operand.hbm [shape: bf16[128,512], index: 5, kind: input, shape index: {}]   ;;  %s3237_s6 = inlined_call_operand.vmem [shape: f32[1,512], index: 6, kind: input, shape index: {}]   ;;  %s3238_s7 = inlined_call_operand.hbm [shape: bf16[256,128], index: 7, kind: input, shape index: {}]   ;;  %s3239_s8 = inlined_call_operand.vmem [shape: f32[1,128], index: 8, kind: input, shape index: {}]   ;;  %s3240_s9 = inlined_call_operand.hbm [shape: f32[8,256], index: 9, kind: output, shape index: {}]  }
   0x1   :  { %15 = vsyncpa [#allocation7], 0 }
   0x2   :  { %16 = vsyncpa [#allocation10], 0 }
   0x3   :  { %17 = vsyncpa [#allocation5], 0  ;;  %s2524_s30 = smov [#allocation6]   ;;  %s2406_s13 = scalar_lea.hbm %s3234_s3, 2048 }
   0x4   :  { %s39_s10 = sshll.u32 %s2524_s30, 4  ;;  %p2407_p0 = scmp.ne.s32.totalorder %s3234_s3, %s2406_s13  ;;  %s40_s10 = int_to_ptr.vmem [resolvable:$true] %s39_s10 }
   0x5   :  { %p2410_p1 = scmp.lt.u32.totalorder %s2406_s13, %s3234_s3 }
   0x7   :  { %p2412_p2 = pnand %p2410_p1, %p2407_p0 }
   0x9   :  { %2415 = shalt.err (!%p2412_p2)
}
   0xa   :  { %s2416_s18 = scalar_lea.vmem %s40_s10, 2048  ;;  %p2421_p4 = scmp.lt.s32.totalorder %s40_s10, %s40_s10 }
   0xb   :  { %p2417_p3 = scmp.ne.s32.totalorder %s40_s10, %s2416_s18  ;;  %p2422_p5 = scmp.lt.s32.totalorder %s2416_s18, %s2416_s18 }
   0xd   :  { %p2423_p6 = por %p2422_p5, %p2421_p4 }
   0xf   :  { %p2424_p7 = pnand %p2423_p6, %p2417_p3 }
  0x11   :  { %2427 = shalt.err (!%p2424_p7)
}
  0x12   :  { %s2525_s19 = smov 64   ;;  %s2526_s20 = smov 4  }
  0x13   :  { %45 = dma.hbm_to_vmem [thread:$0]  %s3234_s3, 2048, %s40_s10, [#allocation7], %s2525_s19, %s2525_s19, %s2526_s20  }
  0x14   :  { %s2527_s23 = smov [#allocation3]   ;;  %s2428_s27 = scalar_lea.hbm %s3233_s2, 4096 }
  0x15   :  { %s27_s24 = sshll.u32 %s2527_s23, 4  ;;  %p2429_p8 = scmp.ne.s32.totalorder %s3233_s2, %s2428_s27  ;;  %s28_s24 = int_to_ptr.vmem [resolvable:$true] %s27_s24 }
  0x16   :  { %p2432_p9 = scmp.lt.u32.totalorder %s2428_s27, %s3233_s2 }
  0x18   :  { %p2434_p10 = pnand %p2432_p9, %p2429_p8 }
  0x1a   :  { %2437 = shalt.err (!%p2434_p10)
}
  0x1b   :  { %s2438_s12 = scalar_lea.vmem %s28_s24, 4096  ;;  %p2443_p12 = scmp.lt.s32.totalorder %s28_s24, %s28_s24 }
  0x1c   :  { %p2439_p11 = scmp.ne.s32.totalorder %s28_s24, %s2438_s12  ;;  %p2444_p13 = scmp.lt.s32.totalorder %s2438_s12, %s2438_s12 }
  0x1e   :  { %p2445_p0 = por %p2444_p13, %p2443_p12 }
  0x20   :  { %p2446_p1 = pnand %p2445_p0, %p2439_p11 }
  0x22   :  { %2449 = shalt.err (!%p2446_p1)
}
  0x23   :  { %s2528_s3 = smov 256   ;;  %s2529_s10 = smov 16  }
  0x24   :  { %33 = dma.hbm_to_vmem [thread:$0]  %s3233_s2, 4096, %s28_s24, [#allocation4], %s2528_s3, %s2528_s3, %s2529_s10  }
  0x25   :  { %s2530_s15 = smov [#allocation8]   ;;  %s2531_s17 = smov [#allocation9]  }
  0x26   :  { %s53_s16 = sshll.u32 %s2530_s15, 4  ;;  %s67_s18 = sshll.u32 %s2531_s17, 4  ;;  %s54_s16 = int_to_ptr.vmem [resolvable:$true] %s53_s16  ;;  %s2612_s18 = int_to_ptr.vmem [resolvable:$true] %s67_s18 }
  0x27   :  { %s2450_s23 = scalar_lea.hbm %s3236_s5, 4096 }
  0x28   :  { %p2451_p2 = scmp.ne.s32.totalorder %s3236_s5, %s2450_s23  ;;  %p2454_p3 = scmp.lt.u32.totalorder %s2450_s23, %s3236_s5 }
  0x2a   :  { %p2456_p4 = pnand %p2454_p3, %p2451_p2 }
  0x2c   :  { %2459 = shalt.err (!%p2456_p4)
}
  0x2d   :  { %s2460_s2 = scalar_lea.vmem %s54_s16, 4096  ;;  %p2465_p6 = scmp.lt.s32.totalorder %s54_s16, %s54_s16 }
  0x2e   :  { %p2461_p5 = scmp.ne.s32.totalorder %s54_s16, %s2460_s2  ;;  %p2466_p7 = scmp.lt.s32.totalorder %s2460_s2, %s2460_s2 }
  0x30   :  { %p2467_p8 = por %p2466_p7, %p2465_p6 }
  0x32   :  { %p2468_p9 = pnand %p2467_p8, %p2461_p5 }
  0x34   :  { %2471 = shalt.err (!%p2468_p9)
}
  0x35   :  { %59 = dma.hbm_to_vmem [thread:$0]  %s3236_s5, 4096, %s54_s16, [#allocation7], %s2528_s3, %s2528_s3, %s2529_s10  }
  0x36   :  { %s2472_s12 = scalar_lea.hbm %s3238_s7, 2048 }
  0x37   :  { %p2473_p10 = scmp.ne.s32.totalorder %s3238_s7, %s2472_s12  ;;  %p2476_p11 = scmp.lt.u32.totalorder %s2472_s12, %s3238_s7 }
  0x39   :  { %p2478_p12 = pnand %p2476_p11, %p2473_p10 }
  0x3b   :  { %2481 = shalt.err (!%p2478_p12)
}
  0x3c   :  { %s2482_s21 = scalar_lea.vmem %s2612_s18, 2048  ;;  %p2487_p0 = scmp.lt.s32.totalorder %s2612_s18, %s2612_s18 }
  0x3d   :  { %p2483_p13 = scmp.ne.s32.totalorder %s2612_s18, %s2482_s21  ;;  %p2488_p1 = scmp.lt.s32.totalorder %s2482_s21, %s2482_s21 }
  0x3f   :  { %p2489_p2 = por %p2488_p1, %p2487_p0 }
  0x41   :  { %p2490_p3 = pnand %p2489_p2, %p2483_p13 }
  0x43   :  { %2493 = shalt.err (!%p2490_p3)
}
  0x44   :  { %73 = dma.hbm_to_vmem [thread:$0]  %s3238_s7, 2048, %s2612_s18, [#allocation10], %s2525_s19, %s2525_s19, %s2526_s20  }
  0x45   :  { %2516 = dma.done.wait [#allocation4], 4096  }
  0x46   :  { %2517 = vsyncadd [#allocation4], 4294963200 }
  0x47   :  { %2518 = dma.done.wait [#allocation7], 6144  }
  0x48   :  { %2519 = vsyncadd [#allocation7], 4294961152 }
  0x49   :  { %2520 = dma.done.wait [#allocation10], 2048  }
  0x4a   :  { %2521 = vsyncadd [#allocation10], 4294965248  ;;  %v3241_v0 = vmov 0   ;;  %v272_v1 = vld [vmem:[%s3232_s1 + $0x10] sm:$0xff]  ;;  %v270_v2 = vld [vmem:[%s3232_s1] sm:$0xff]  ;;  %v278_v63 = vlaneseq  ;;  %s2534_s21 = smov [#allocation11]  }
  0x4b   :  { %2161 = vset.pattern.permute.xlu1 %v3241_v0  ;;  %2160 = vset.pattern.permute.xlu0 %v3241_v0  ;;  %v273_v3 = vld [vmem:[%s3232_s1 + $0x18] sm:$0xff]  ;;  %v271_v4 = vld [vmem:[%s3232_s1 + $0x8] sm:$0xff]  ;;  %v2162_v5 = vld [vmem:[#allocation6 + $0x40] sm:$0xff]   ;;  %s1972_s5 = sshll.u32 %s2534_s21, 4  ;;  %s1973_s5 = int_to_ptr.vmem [resolvable:$true] %s1972_s5 }
  0x4c   :  { %578 = vmatprep.mubr.bf16.mxu1 %v3241_v0  ;;  %287 = vperm.xlu1 %2161, %v272_v1   ;;  %v275_v6 = vld [vmem:[%s3232_s1 + $0x28] sm:$0xff]  ;;  %v2163_v7 = vld [vmem:[#allocation6] sm:$0xff]   ;;  %v2166_v11 = vld [vmem:[#allocation6 + $0x50] sm:$0xff]   ;;  %s2494_s3 = scalar_lea.vmem %s1973_s5, 256  ;;  %p2499_p5 = scmp.lt.s32.totalorder %s1973_s5, %s1973_s5 }
  0x4d   :  { %281 = vperm.xlu0 %2160, %v270_v2   ;;  %v2164_v8 = vld [vmem:[#allocation6 + $0x48] sm:$0xff]   ;;  %v274_v9 = vld [vmem:[%s3232_s1 + $0x20] sm:$0xff]  ;;  %2105 = vmatprep.subr.bf16.mxu0 %v2162_v5  ;;  %v277_v12 = vld [vmem:[%s3232_s1 + $0x38] sm:$0xff]  ;;  %v2687_v2 = vand.u32 127, %v278_v63  ;;  %p2495_p4 = scmp.ne.s32.totalorder %s1973_s5, %s2494_s3  ;;  %p2500_p6 = scmp.lt.s32.totalorder %s2494_s3, %s2494_s3 }
  0x4e   :  { %2106 = vmatpush3.bf16.msra.mxu0 %v2163_v7  ;;  %v2165_v10 = vld [vmem:[#allocation6 + $0x8] sm:$0xff]   ;;  %v276_v13 = vld [vmem:[%s3232_s1 + $0x30] sm:$0xff]  ;;  %v2168_v15 = vld [vmem:[#allocation6 + $0x58] sm:$0xff]  }
  0x4f   :  { %2107 = vmatprep.subr.bf16.mxu0 %v2164_v8  ;;  %v2167_v14 = vld [vmem:[#allocation6 + $0x10] sm:$0xff]   ;;  %v2169_v16 = vld [vmem:[#allocation6 + $0x18] sm:$0xff]   ;;  %v2170_v17 = vld [vmem:[#allocation6 + $0x60] sm:$0xff]   ;;  %p2501_p7 = por %p2500_p6, %p2499_p5 }
  0x50   :  { %290 = vperm.xlu1 %2161, %v273_v3   ;;  %v2171_v18 = vld [vmem:[#allocation6 + $0x20] sm:$0xff]   ;;  %v2172_v19 = vld [vmem:[#allocation6 + $0x68] sm:$0xff]   ;;  %v2174_v27 = vld [vmem:[#allocation6 + $0x70] sm:$0xff]  }
  0x51   :  { %284 = vperm.xlu0 %2160, %v271_v4   ;;  %v2178_v20 = vld [vmem:[#allocation3 + $0x4] ss:$16 sps:$4 sm:$0xff]   ;;  %v90_v21 = vld [vmem:[%s3231_s0 + $0x8] sm:$0xff]  ;;  %v2180_v23 = vld [vmem:[#allocation3] ss:$16 sps:$4 sm:$0xff]   ;;  %p2502_p8 = pnand %p2501_p7, %p2495_p4 }
  0x52   :  { %2108 = vmatpush3.bf16.msra.mxu0 %v2165_v10  ;;  %v92_v22 = vpack.c.bf16 %v90_v21, %v90_v21  ;;  %v2173_v24 = vld [vmem:[#allocation6 + $0x28] sm:$0xff]   ;;  %546 = vmatprep.subr.bf16.mxu1 %v2178_v20  ;;  %v2184_v25 = vld [vmem:[#allocation3 + $0x24] ss:$16 sps:$4 sm:$0xff]   ;;  %v2186_v26 = vld [vmem:[#allocation3 + $0x20] ss:$16 sps:$4 sm:$0xff]  }
  0x53   :  { %2109 = vmatprep.subr.bf16.mxu0 %v2166_v11  ;;  %547 = vmatpush1.bf16.msra.mxu1 %v2180_v23  ;;  %v2190_v28 = vld [vmem:[#allocation3 + $0x44] ss:$16 sps:$4 sm:$0xff]   ;;  %v2192_v29 = vld [vmem:[#allocation3 + $0x40] ss:$16 sps:$4 sm:$0xff]   ;;  %v2176_v31 = vld [vmem:[#allocation6 + $0x78] sm:$0xff]  }
  0x54   :  { %296 = vperm.xlu1 %2161, %v275_v6   ;;  %260 = vmatprep.mubr.bf16.mxu0 %v92_v22  ;;  %v2175_v30 = vld [vmem:[#allocation6 + $0x30] sm:$0xff]   ;;  %v2177_v33 = vld [vmem:[#allocation6 + $0x38] sm:$0xff]   ;;  %v89_v34 = vld [vmem:[%s3231_s0] sm:$0xff] }
  0x55   :  { %293 = vperm.xlu0 %2160, %v274_v9   ;;  %548 = vmatprep.subr.bf16.mxu1 %v2184_v25  ;;  %v2196_v32 = vld [vmem:[#allocation3 + $0x64] ss:$16 sps:$4 sm:$0xff]   ;;  %v2198_v35 = vld [vmem:[#allocation3 + $0x60] ss:$16 sps:$4 sm:$0xff]   ;;  %v2183_v37 = vld [vmem:[#allocation3 + $0xc] ss:$16 sps:$4 sm:$0xff]   ;;  %v91_v39 = vpack.c.bf16 %v89_v34, %v89_v34 }
  0x56   :  { %2110 = vmatpush3.bf16.msra.mxu0 %v2167_v14  ;;  %v2202_v36 = vld [vmem:[#allocation3 + $0x84] ss:$16 sps:$4 sm:$0xff]   ;;  %v2181_v38 = vld [vmem:[#allocation3 + $0x8] ss:$16 sps:$4 sm:$0xff]   ;;  %v2204_v40 = vld [vmem:[#allocation3 + $0x80] ss:$16 sps:$4 sm:$0xff]  }
  0x57   :  { %2111 = vmatprep.subr.bf16.mxu0 %v2168_v15  ;;  %549 = vmatpush1.bf16.msra.mxu1 %v2186_v26  ;;  %v2208_v41 = vld [vmem:[#allocation3 + $0xa4] ss:$16 sps:$4 sm:$0xff]   ;;  %v2189_v42 = vld [vmem:[#allocation3 + $0x2c] ss:$16 sps:$4 sm:$0xff]   ;;  %v2187_v43 = vld [vmem:[#allocation3 + $0x28] ss:$16 sps:$4 sm:$0xff]  }
  0x58   :  { %302 = vperm.xlu1 %2161, %v277_v12   ;;  %550 = vmatprep.subr.bf16.mxu1 %v2190_v28  ;;  %v2210_v44 = vld [vmem:[#allocation3 + $0xa0] ss:$16 sps:$4 sm:$0xff]   ;;  %v2214_v45 = vld [vmem:[#allocation3 + $0xc4] ss:$16 sps:$4 sm:$0xff]   ;;  %v2195_v46 = vld [vmem:[#allocation3 + $0x4c] ss:$16 sps:$4 sm:$0xff]  }
  0x59   :  { %299 = vperm.xlu0 %2160, %v276_v13   ;;  %v2193_v47 = vld [vmem:[#allocation3 + $0x48] ss:$16 sps:$4 sm:$0xff]   ;;  %v2216_v48 = vld [vmem:[#allocation3 + $0xc0] ss:$16 sps:$4 sm:$0xff]   ;;  %v2220_v49 = vld [vmem:[#allocation3 + $0xe4] ss:$16 sps:$4 sm:$0xff]  }
  0x5a   :  { %2112 = vmatpush3.bf16.msra.mxu0 %v2169_v16  ;;  %v2201_v50 = vld [vmem:[#allocation3 + $0x6c] ss:$16 sps:$4 sm:$0xff]   ;;  %v2199_v51 = vld [vmem:[#allocation3 + $0x68] ss:$16 sps:$4 sm:$0xff]   ;;  %v2222_v52 = vld [vmem:[#allocation3 + $0xe0] ss:$16 sps:$4 sm:$0xff]  }
  0x5b   :  { %2113 = vmatprep.subr.bf16.mxu0 %v2170_v17  ;;  %551 = vmatpush1.bf16.msra.mxu1 %v2192_v29  ;;  %v2680_v53 = vld [vmem:[#allocation8 + $0x4] ss:$16 sps:$4 sm:$0xff]   ;;  %v2207_v54 = vld [vmem:[#allocation3 + $0x8c] ss:$16 sps:$4 sm:$0xff]   ;;  %v2205_v55 = vld [vmem:[#allocation3 + $0x88] ss:$16 sps:$4 sm:$0xff]  }
  0x5c   :  { %552 = vmatprep.subr.bf16.mxu1 %v2196_v32  ;;  %v2213_v56 = vld [vmem:[#allocation3 + $0xac] ss:$16 sps:$4 sm:$0xff]   ;;  %v2211_v57 = vld [vmem:[#allocation3 + $0xa8] ss:$16 sps:$4 sm:$0xff]   ;;  %v2690_v5 = vld [vmem:[#allocation8] ss:$16 sps:$4 sm:$0xff]  }
  0x5d   :  { %v2219_v58 = vld [vmem:[#allocation3 + $0xcc] ss:$16 sps:$4 sm:$0xff]   ;;  %v2217_v59 = vld [vmem:[#allocation3 + $0xc8] ss:$16 sps:$4 sm:$0xff]   ;;  %v2695_v7 = vld [vmem:[#allocation8 + $0x24] ss:$16 sps:$4 sm:$0xff]  }
  0x5e   :  { %2114 = vmatpush3.bf16.msra.mxu0 %v2171_v18  ;;  %v2225_v60 = vld [vmem:[#allocation3 + $0xec] ss:$16 sps:$4 sm:$0xff]   ;;  %v2223_v61 = vld [vmem:[#allocation3 + $0xe8] ss:$16 sps:$4 sm:$0xff]   ;;  %v2533_v9 = vmov 1.0|1.0  }
  0x5f   :  { %2115 = vmatprep.subr.bf16.mxu0 %v2172_v19  ;;  %553 = vmatpush1.bf16.msra.mxu1 %v2198_v35  ;;  %v2683_v62 = vld [vmem:[#allocation8 + $0xc] ss:$16 sps:$4 sm:$0xff]   ;;  %v2692_v6 = vld [vmem:[#allocation8 + $0x8] ss:$16 sps:$4 sm:$0xff]   ;;  %v2703_v10 = vld [vmem:[#allocation8 + $0x20] ss:$16 sps:$4 sm:$0xff]  }
  0x60   :  { %554 = vmatprep.subr.bf16.mxu1 %v2202_v36  ;;  %v2697_v8 = vld [vmem:[#allocation8 + $0x2c] ss:$16 sps:$4 sm:$0xff]   ;;  %v2705_v11 = vld [vmem:[#allocation8 + $0x28] ss:$16 sps:$4 sm:$0xff]   ;;  %v2709_v12 = vld [vmem:[#allocation8 + $0x44] ss:$16 sps:$4 sm:$0xff]  }
  0x61   :  { %v2711_v13 = vld [vmem:[#allocation8 + $0x4c] ss:$16 sps:$4 sm:$0xff]   ;;  %v2719_v15 = vld [vmem:[#allocation8 + $0x40] ss:$16 sps:$4 sm:$0xff]   ;;  %v2721_v16 = vld [vmem:[#allocation8 + $0x48] ss:$16 sps:$4 sm:$0xff]  }
  0x62   :  { %2116 = vmatpush3.bf16.msra.mxu0 %v2173_v24  ;;  %v2725_v17 = vld [vmem:[#allocation8 + $0x64] ss:$16 sps:$4 sm:$0xff]   ;;  %v2727_v18 = vld [vmem:[#allocation8 + $0x6c] ss:$16 sps:$4 sm:$0xff]   ;;  %v2733_v21 = vld [vmem:[#allocation8 + $0x60] ss:$16 sps:$4 sm:$0xff]  }
  0x63   :  { %2117 = vmatprep.subr.bf16.mxu0 %v2174_v27  ;;  %555 = vmatpush1.bf16.msra.mxu1 %v2204_v40  ;;  %v2735_v22 = vld [vmem:[#allocation8 + $0x68] ss:$16 sps:$4 sm:$0xff]   ;;  %v2739_v23 = vld [vmem:[#allocation8 + $0x84] ss:$16 sps:$4 sm:$0xff]   ;;  %v2741_v24 = vld [vmem:[#allocation8 + $0x8c] ss:$16 sps:$4 sm:$0xff]  }
  0x64   :  { %556 = vmatprep.subr.bf16.mxu1 %v2208_v41  ;;  %v2749_v25 = vld [vmem:[#allocation8 + $0x80] ss:$16 sps:$4 sm:$0xff]   ;;  %v2751_v26 = vld [vmem:[#allocation8 + $0x88] ss:$16 sps:$4 sm:$0xff]   ;;  %v2755_v27 = vld [vmem:[#allocation8 + $0xa4] ss:$16 sps:$4 sm:$0xff]  }
  0x65   :  { %v2757_v28 = vld [vmem:[#allocation8 + $0xac] ss:$16 sps:$4 sm:$0xff]   ;;  %v2765_v32 = vld [vmem:[#allocation8 + $0xa8] ss:$16 sps:$4 sm:$0xff]   ;;  %v2779_v35 = vld [vmem:[#allocation8 + $0xc0] ss:$16 sps:$4 sm:$0xff]  }
  0x66   :  { %2118 = vmatpush3.bf16.msra.mxu0 %v2175_v30  ;;  %v2771_v34 = vld [vmem:[#allocation8 + $0xcc] ss:$16 sps:$4 sm:$0xff]   ;;  %v2781_v36 = vld [vmem:[#allocation8 + $0xc8] ss:$16 sps:$4 sm:$0xff]  }
  0x67   :  { %2119 = vmatprep.subr.bf16.mxu0 %v2176_v31  ;;  %557 = vmatpush1.bf16.msra.mxu1 %v2210_v44  ;;  %v2763_v31 = vld [vmem:[#allocation8 + $0xa0] ss:$16 sps:$4 sm:$0xff]   ;;  %v2795_v40 = vld [vmem:[#allocation8 + $0xe8] ss:$16 sps:$4 sm:$0xff]  }
  0x68   :  { %558 = vmatprep.subr.bf16.mxu1 %v2214_v45 }
  0x6a   :  { %2120 = vmatpush3.bf16.msra.mxu0 %v2177_v33  ;;  %v2769_v33 = vld [vmem:[#allocation8 + $0xc4] ss:$16 sps:$4 sm:$0xff]  }
  0x6b   :  { %619 = vmatprep.subr.bf16.mxu0 %v2183_v37  ;;  %559 = vmatpush1.bf16.msra.mxu1 %v2216_v48  ;;  %v2785_v37 = vld [vmem:[#allocation8 + $0xe4] ss:$16 sps:$4 sm:$0xff]  }
  0x6c   :  { %560 = vmatprep.subr.bf16.mxu1 %v2220_v49  ;;  %v367_v49 = vshrl.u32 %v278_v63, 7 }
  0x6d   :  { %261 = vmatmul.mubr.bf16.vlgmr.msra.gmra.mrb[0].mxu0 %v91_v39  ;;  %v2793_v39 = vld [vmem:[#allocation8 + $0xe0] ss:$16 sps:$4 sm:$0xff]  }
  0x6e   :  { %620 = vmatpush1.bf16.msra.mxu0 %v2181_v38  ;;  %651 = vmatprep.mubr.bf16.mxu0 %v3241_v0  ;;  %v2787_v38 = vld [vmem:[#allocation8 + $0xec] ss:$16 sps:$4 sm:$0xff]  }
  0x6f   :  { %621 = vmatprep.subr.bf16.mxu0 %v2189_v42  ;;  %561 = vmatpush1.bf16.msra.mxu1 %v2222_v52  ;;  %v1983_v42 = vld [vmem:[%s3235_s4] ss:$0 sm:$0xff] }
  0x70   :  { %920 = vmatprep.subr.bf16.mxu1 %v2680_v53  ;;  %v364_v52 = vld [vmem:[%s3237_s6] sm:$0xf] }
  0x72   :  { %622 = vmatpush1.bf16.msra.mxu0 %v2187_v43 }
  0x73   :  { %623 = vmatprep.subr.bf16.mxu0 %v2195_v46 }
  0x76   :  { %624 = vmatpush1.bf16.msra.mxu0 %v2193_v47 }
  0x77   :  { %625 = vmatprep.subr.bf16.mxu0 %v2201_v50  ;;  %v368_v50 = vsub.s32 0, %v367_v49 }
  0x7a   :  { %626 = vmatpush1.bf16.msra.mxu0 %v2199_v51  ;;  %v376_v51 = vsub.s32 2, %v367_v49 }
  0x7b   :  { %627 = vmatprep.subr.bf16.mxu0 %v2207_v54  ;;  %v372_v54 = vsub.s32 1, %v367_v49 }
  0x7e   :  { %628 = vmatpush1.bf16.msra.mxu0 %v2205_v55  ;;  %v380_v55 = vsub.s32 3, %v367_v49 }
  0x7f   :  { %629 = vmatprep.subr.bf16.mxu0 %v2213_v56  ;;  %v369_v56 = vrot.slane %v364_v52, %v368_v50 }
  0x82   :  { %630 = vmatpush1.bf16.msra.mxu0 %v2211_v57  ;;  %v377_v57 = vrot.slane %v364_v52, %v376_v51 }
  0x83   :  { %631 = vmatprep.subr.bf16.mxu0 %v2219_v58  ;;  %v2848_v58 = vrot.slane %v364_v52, %v372_v54 }
  0x86   :  { %632 = vmatpush1.bf16.msra.mxu0 %v2217_v59  ;;  %v2850_v59 = vrot.slane %v364_v52, %v380_v55 }
  0x87   :  { %633 = vmatprep.subr.bf16.mxu0 %v2225_v60 }
  0x8a   :  { %634 = vmatpush1.bf16.msra.mxu0 %v2223_v61 }
  0x8b   :  { %961 = vmatprep.subr.bf16.mxu0 %v2683_v62 }
  0xcb   :  { %v288_v4 = vpop.permute.xlu1 %287 }
  0xcc   :  { %v282_v1 = vpop.permute.xlu0 %281  ;;  %vm306_vm3 = vcmp.eq.s32.totalorder %v288_v4, %v2687_v2 }
  0xcd   :  { %vm304_vm1 = vcmp.eq.s32.totalorder %v282_v1, %v2687_v2 }
  0xcf   :  { %v291_v14 = vpop.permute.xlu1 %290 }
  0xd0   :  { %v285_v3 = vpop.permute.xlu0 %284  ;;  %vm307_vm4 = vcmp.eq.s32.totalorder %v291_v14, %v2687_v2 }
  0xd1   :  { %vm305_vm0 = vcmp.eq.s32.totalorder %v285_v3, %v2687_v2  ;;  %vm2042_vm5 = vmpackc.low %vm307_vm4, %vm306_vm3 }
  0xd2   :  { %vm2040_vm2 = vmpackc.low %vm305_vm0, %vm304_vm1 }
  0xd3   :  { %2041 = vmatmul.mubr.msk.bf16.vlgmr.msra.gmra.mrb[0].mxu1 %vm2040_vm2, %v2533_v9  ;;  %2049 = vmatmul.mubr.msk.bf16.vlgmr.msra.gmra.mrb[4].mxu0 %vm2040_vm2, %v2533_v9  ;;  %v297_v19 = vpop.permute.xlu1 %296 }
  0xd4   :  { %921 = vmatpush1.bf16.msra.mxu1 %v2690_v5  ;;  %962 = vmatpush1.bf16.msra.mxu0 %v2692_v6  ;;  %v294_v20 = vpop.permute.xlu0 %293  ;;  %vm309_vm6 = vcmp.eq.s32.totalorder %v297_v19, %v2687_v2 }
  0xd5   :  { %922 = vmatprep.subr.bf16.mxu1 %v2695_v7  ;;  %963 = vmatprep.subr.bf16.mxu0 %v2697_v8  ;;  %vm308_vm7 = vcmp.eq.s32.totalorder %v294_v20, %v2687_v2 }
  0xd6   :  { %588 = vmatprep.mubr.bf16.mxu1 %v3241_v0  ;;  %661 = vmatprep.mubr.bf16.mxu0 %v3241_v0  ;;  %vm2044_vm8 = vmpackc.low %vm309_vm6, %vm308_vm7 }
  0xd7   :  { %v303_v29 = vpop.permute.xlu1 %302 }
  0xd8   :  { %923 = vmatpush1.bf16.msra.mxu1 %v2703_v10  ;;  %964 = vmatpush1.bf16.msra.mxu0 %v2705_v11  ;;  %v300_v30 = vpop.permute.xlu0 %299  ;;  %vm311_vm9 = vcmp.eq.s32.totalorder %v303_v29, %v2687_v2 }
  0xd9   :  { %924 = vmatprep.subr.bf16.mxu1 %v2709_v12  ;;  %965 = vmatprep.subr.bf16.mxu0 %v2711_v13  ;;  %vm310_vm10 = vcmp.eq.s32.totalorder %v300_v30, %v2687_v2 }
  0xda   :  { %vm2046_vm11 = vmpackc.low %vm311_vm9, %vm310_vm10 }
  0xdb   :  { %2043 = vmatmul.mubr.msk.bf16.gmra.mrb[4].mxu1 %vm2042_vm5, %v2533_v9  ;;  %2051 = vmatmul.mubr.msk.bf16.gmra.mrb[8].mxu0 %vm2042_vm5, %v2533_v9 }
  0xdc   :  { %925 = vmatpush1.bf16.msra.mxu1 %v2719_v15  ;;  %966 = vmatpush1.bf16.msra.mxu0 %v2721_v16 }
  0xdd   :  { %926 = vmatprep.subr.bf16.mxu1 %v2725_v17  ;;  %967 = vmatprep.subr.bf16.mxu0 %v2727_v18 }
  0xde   :  { %598 = vmatprep.mubr.bf16.mxu1 %v3241_v0  ;;  %671 = vmatprep.mubr.bf16.mxu0 %v3241_v0 }
  0xe0   :  { %927 = vmatpush1.bf16.msra.mxu1 %v2733_v21  ;;  %968 = vmatpush1.bf16.msra.mxu0 %v2735_v22 }
  0xe1   :  { %928 = vmatprep.subr.bf16.mxu1 %v2739_v23  ;;  %969 = vmatprep.subr.bf16.mxu0 %v2741_v24 }
  0xe3   :  { %2045 = vmatmul.mubr.msk.bf16.gmra.mrb[8].mxu1 %vm2044_vm8, %v2533_v9  ;;  %2053 = vmatmul.mubr.msk.bf16.gmra.mrb[12].mxu0 %vm2044_vm8, %v2533_v9 }
  0xe4   :  { %929 = vmatpush1.bf16.msra.mxu1 %v2749_v25  ;;  %970 = vmatpush1.bf16.msra.mxu0 %v2751_v26 }
  0xe5   :  { %930 = vmatprep.subr.bf16.mxu1 %v2755_v27  ;;  %971 = vmatprep.subr.bf16.mxu0 %v2757_v28 }
  0xe6   :  { %608 = vmatprep.mubr.bf16.mxu1 %v3241_v0  ;;  %681 = vmatprep.mubr.bf16.mxu0 %v3241_v0 }
  0xe8   :  { %931 = vmatpush1.bf16.msra.mxu1 %v2763_v31  ;;  %972 = vmatpush1.bf16.msra.mxu0 %v2765_v32 }
  0xe9   :  { %932 = vmatprep.subr.bf16.mxu1 %v2769_v33  ;;  %973 = vmatprep.subr.bf16.mxu0 %v2771_v34 }
  0xeb   :  { %2047 = vmatmul.mubr.msk.bf16.gmra.mrb[12].mxu1 %vm2046_vm11, %v2533_v9  ;;  %2055 = vmatmul.mubr.msk.bf16.gmra.mrb[16].mxu0 %vm2046_vm11, %v2533_v9 }
  0xec   :  { %933 = vmatpush1.bf16.msra.mxu1 %v2779_v35  ;;  %974 = vmatpush1.bf16.msra.mxu0 %v2781_v36 }
  0xed   :  { %934 = vmatprep.subr.bf16.mxu1 %v2785_v37  ;;  %975 = vmatprep.subr.bf16.mxu0 %v2787_v38 }
  0xee   :  { %952 = vmatprep.mubr.bf16.mxu1 %v3241_v0  ;;  %993 = vmatprep.mubr.bf16.mxu0 %v3241_v0 }
  0xf0   :  { %935 = vmatpush1.bf16.msra.mxu1 %v2793_v39  ;;  %976 = vmatpush1.bf16.msra.mxu0 %v2795_v40 }
  0xf1   :  { %1029 = vmatprep.subr.bf16.mxu1 %v2680_v53  ;;  %1070 = vmatprep.subr.bf16.mxu0 %v2683_v62 }
  0xf3   :  { %953 = vmatmul.mubr.bf16.vlgmr.msra.gmra.mrb[16].mxu1 %v3241_v0  ;;  %994 = vmatmul.mubr.bf16.vlgmr.msra.gmra.mrb[20].mxu0 %v3241_v0 }
  0xf4   :  { %1030 = vmatpush1.bf16.msra.mxu1 %v2690_v5  ;;  %1071 = vmatpush1.bf16.msra.mxu0 %v2692_v6 }
  0xf5   :  { %1031 = vmatprep.subr.bf16.mxu1 %v2695_v7  ;;  %1072 = vmatprep.subr.bf16.mxu0 %v2697_v8 }
  0xf6   :  { %1061 = vmatprep.mubr.bf16.mxu1 %v3241_v0  ;;  %1102 = vmatprep.mubr.bf16.mxu0 %v3241_v0 }
  0xf8   :  { %1032 = vmatpush1.bf16.msra.mxu1 %v2703_v10  ;;  %1073 = vmatpush1.bf16.msra.mxu0 %v2705_v11 }
  0xf9   :  { %1033 = vmatprep.subr.bf16.mxu1 %v2709_v12  ;;  %1074 = vmatprep.subr.bf16.mxu0 %v2711_v13 }
  0xfc   :  { %1034 = vmatpush1.bf16.msra.mxu1 %v2719_v15  ;;  %1075 = vmatpush1.bf16.msra.mxu0 %v2721_v16 }
  0xfd   :  { %1035 = vmatprep.subr.bf16.mxu1 %v2725_v17  ;;  %1076 = vmatprep.subr.bf16.mxu0 %v2727_v18 }
 0x100   :  { %1036 = vmatpush1.bf16.msra.mxu1 %v2733_v21  ;;  %1077 = vmatpush1.bf16.msra.mxu0 %v2735_v22 }
 0x101   :  { %1037 = vmatprep.subr.bf16.mxu1 %v2739_v23  ;;  %1078 = vmatprep.subr.bf16.mxu0 %v2741_v24 }
 0x104   :  { %1038 = vmatpush1.bf16.msra.mxu1 %v2749_v25  ;;  %1079 = vmatpush1.bf16.msra.mxu0 %v2751_v26 }
 0x105   :  { %1039 = vmatprep.subr.bf16.mxu1 %v2755_v27  ;;  %1080 = vmatprep.subr.bf16.mxu0 %v2757_v28 }
 0x108   :  { %1040 = vmatpush1.bf16.msra.mxu1 %v2763_v31  ;;  %1081 = vmatpush1.bf16.msra.mxu0 %v2765_v32 }
 0x109   :  { %1041 = vmatprep.subr.bf16.mxu1 %v2769_v33  ;;  %1082 = vmatprep.subr.bf16.mxu0 %v2771_v34 }
 0x10c   :  { %1042 = vmatpush1.bf16.msra.mxu1 %v2779_v35  ;;  %1083 = vmatpush1.bf16.msra.mxu0 %v2781_v36 }
 0x10d   :  { %1043 = vmatprep.subr.bf16.mxu1 %v2785_v37  ;;  %1084 = vmatprep.subr.bf16.mxu0 %v2787_v38 }
 0x110   :  { %1044 = vmatpush1.bf16.msra.mxu1 %v2793_v39  ;;  %1085 = vmatpush1.bf16.msra.mxu0 %v2795_v40 }
 0x111   :  { %1138 = vmatprep.subr.bf16.mxu1 %v2680_v53  ;;  %1179 = vmatprep.subr.bf16.mxu0 %v2683_v62 }
 0x140   :  { %v2121_v41 = vpop.f32.mrb[0].mxu0 }
 0x141   :  { %v2122_v43 = vpop.f32.mrb[1].mxu0 }
 0x142   :  { %v2123_v44 = vadd.f32 %v2122_v43, %v2121_v41  ;;  %v2124_v45 = vpop.f32.mrb[2].mxu0 }
 0x143   :  { %v2125_v46 = vpop.f32.mrb[3].mxu0 }
 0x144   :  { %v263_v47 = vadd.f32 %v2123_v44, %v1983_v42 }
 0x146   :  { %2290 = vtanh.f32 %v263_v47 }
 0x150   :  { %v2291_v48 = vpop.eup %2290 }
 0x151   :  { %269 = vst [vmem:[#allocation11] sm:$0xff] %v2291_v48 }
 0x1a6   :  { %v580_v60 = vpop.f32.mrb[0].mxu1  ;;  %v653_v61 = vpop.f32.mrb[4].mxu0 }
 0x1a7   :  { %v2852_v1 = vadd.f32 %v580_v60, %v369_v56  ;;  %v2854_v2 = vadd.f32 %v653_v61, %v377_v57  ;;  %v582_v63 = vpop.f32.mrb[1].mxu1  ;;  %v655_v3 = vpop.f32.mrb[5].mxu0 }
 0x1a8   :  { %v2857_v4 = vadd.f32 %v582_v63, %v2848_v58  ;;  %v2860_v9 = vadd.f32 %v655_v3, %v2850_v59  ;;  %v584_v14 = vpop.f32.mrb[2].mxu1  ;;  %v657_v19 = vpop.f32.mrb[6].mxu0 }
 0x1a9   :  { %v2862_v20 = vadd.f32 %v584_v14, %v369_v56  ;;  %v2864_v29 = vadd.f32 %v657_v19, %v377_v57  ;;  %v586_v30 = vpop.f32.mrb[3].mxu1  ;;  %v659_v41 = vpop.f32.mrb[7].mxu0 }
 0x1aa   :  { %v2867_v42 = vadd.f32 %v586_v30, %v2848_v58  ;;  %v2870_v43 = vadd.f32 %v659_v41, %v2850_v59 }
 0x1ae   :  { %v590_v44 = vpop.f32.mrb[4].mxu1  ;;  %v663_v45 = vpop.f32.mrb[8].mxu0 }
 0x1af   :  { %v2872_v46 = vadd.f32 %v590_v44, %v369_v56  ;;  %v2874_v47 = vadd.f32 %v663_v45, %v377_v57  ;;  %v592_v48 = vpop.f32.mrb[5].mxu1  ;;  %v665_v49 = vpop.f32.mrb[9].mxu0 }
 0x1b0   :  { %v2877_v50 = vadd.f32 %v592_v48, %v2848_v58  ;;  %v2880_v51 = vadd.f32 %v665_v49, %v2850_v59  ;;  %v594_v52 = vpop.f32.mrb[6].mxu1  ;;  %v667_v54 = vpop.f32.mrb[10].mxu0 }
 0x1b1   :  { %v2882_v55 = vadd.f32 %v594_v52, %v369_v56  ;;  %v2884_v60 = vadd.f32 %v667_v54, %v377_v57  ;;  %v596_v61 = vpop.f32.mrb[7].mxu1  ;;  %v669_v63 = vpop.f32.mrb[11].mxu0 }
 0x1b2   :  { %v2887_v3 = vadd.f32 %v596_v61, %v2848_v58  ;;  %v2890_v14 = vadd.f32 %v669_v63, %v2850_v59 }
 0x1b4   :  { %3243 = vst [vmem:[#allocation16_spill] sm:$0xff] %v2887_v3  ;;  %3244 = vst [vmem:[#allocation17_spill] sm:$0xff] %v2890_v14 }
 0x1b6   :  { %v600_v19 = vpop.f32.mrb[8].mxu1  ;;  %v673_v30 = vpop.f32.mrb[12].mxu0 }
 0x1b7   :  { %v2892_v41 = vadd.f32 %v600_v19, %v369_v56  ;;  %v2894_v44 = vadd.f32 %v673_v30, %v377_v57  ;;  %v602_v45 = vpop.f32.mrb[9].mxu1  ;;  %v675_v48 = vpop.f32.mrb[13].mxu0 }
 0x1b8   :  { %v2897_v49 = vadd.f32 %v602_v45, %v2848_v58  ;;  %v2900_v52 = vadd.f32 %v675_v48, %v2850_v59  ;;  %v604_v54 = vpop.f32.mrb[10].mxu1  ;;  %v677_v61 = vpop.f32.mrb[14].mxu0 }
 0x1b9   :  { %3245 = vst [vmem:[#allocation18_spill] sm:$0xff] %v2892_v41  ;;  %3246 = vst [vmem:[#allocation19_spill] sm:$0xff] %v2894_v44  ;;  %v2902_v0 = vadd.f32 %v604_v54, %v369_v56  ;;  %v2904_v63 = vadd.f32 %v677_v61, %v377_v57  ;;  %v606_v14 = vpop.f32.mrb[11].mxu1  ;;  %v679_v3 = vpop.f32.mrb[15].mxu0 }
 0x1ba   :  { %3247 = vst [vmem:[#allocation20_spill] sm:$0xff] %v2897_v49  ;;  %3248 = vst [vmem:[#allocation21_spill] sm:$0xff] %v2900_v52  ;;  %v2907_v19 = vadd.f32 %v606_v14, %v2848_v58  ;;  %v2910_v30 = vadd.f32 %v679_v3, %v2850_v59 }
 0x1bb   :  { %3249 = vst [vmem:[#allocation22_spill] sm:$0xff] %v2902_v0  ;;  %3250 = vst [vmem:[#allocation23_spill] sm:$0xff] %v2904_v63 }
 0x1bc   :  { %3251 = vst [vmem:[#allocation24_spill] sm:$0xff] %v2907_v19  ;;  %3252 = vst [vmem:[#allocation25_spill] sm:$0xff] %v2910_v30 }
 0x1be   :  { %v610_v44 = vpop.f32.mrb[12].mxu1  ;;  %v683_v45 = vpop.f32.mrb[16].mxu0 }
 0x1bf   :  { %v2912_v49 = vadd.f32 %v610_v44, %v369_v56  ;;  %v2914_v48 = vadd.f32 %v683_v45, %v377_v57  ;;  %v612_v52 = vpop.f32.mrb[13].mxu1  ;;  %v685_v41 = vpop.f32.mrb[17].mxu0 }
 0x1c0   :  { %v2917_v54 = vadd.f32 %v612_v52, %v2848_v58  ;;  %v2920_v61 = vadd.f32 %v685_v41, %v2850_v59  ;;  %v614_v63 = vpop.f32.mrb[14].mxu1  ;;  %v687_v14 = vpop.f32.mrb[18].mxu0 }
 0x1c1   :  { %3253 = vst [vmem:[#allocation26_spill] sm:$0xff] %v2912_v49  ;;  %3254 = vst [vmem:[#allocation27_spill] sm:$0xff] %v2914_v48  ;;  %v2922_v19 = vadd.f32 %v614_v63, %v369_v56  ;;  %v2924_v3 = vadd.f32 %v687_v14, %v377_v57  ;;  %v616_v30 = vpop.f32.mrb[15].mxu1  ;;  %v689_v0 = vpop.f32.mrb[19].mxu0 }
 0x1c2   :  { %3255 = vst [vmem:[#allocation28_spill] sm:$0xff] %v2917_v54  ;;  %3256 = vst [vmem:[#allocation29_spill] sm:$0xff] %v2920_v61  ;;  %v2927_v44 = vadd.f32 %v616_v30, %v2848_v58  ;;  %v2930_v45 = vadd.f32 %v689_v0, %v2850_v59 }
 0x1c3   :  { %3257 = vst [vmem:[#allocation30_spill] sm:$0xff] %v2924_v3 }
 0x1c4   :  { %3258 = vst [vmem:[#allocation31_spill] sm:$0xff] %v2927_v44  ;;  %3259 = vst [vmem:[#allocation32_spill] sm:$0xff] %v2930_v45 }
 0x1c6   :  { %v954_v48 = vpop.f32.mrb[16].mxu1  ;;  %v995_v52 = vpop.f32.mrb[20].mxu0 }
 0x1c7   :  { %v1002_v54 = vadd.f32 %v954_v48, %v2852_v1  ;;  %v1004_v41 = vadd.f32 %v995_v52, %v2854_v2  ;;  %v956_v61 = vpop.f32.mrb[17].mxu1  ;;  %v997_v49 = vpop.f32.mrb[21].mxu0 }
 0x1c8   :  { %v1003_v56 = vadd.f32 %v956_v61, %v2857_v4  ;;  %v1005_v57 = vadd.f32 %v997_v49, %v2860_v9  ;;  %v958_v63 = vpop.f32.mrb[18].mxu1  ;;  %v999_v14 = vpop.f32.mrb[22].mxu0 }
 0x1c9   :  { %v1006_v3 = vmul.f32 0.5, %v1002_v54  ;;  %v959_v58 = vpop.f32.mrb[19].mxu1  ;;  %v1000_v30 = vpop.f32.mrb[23].mxu0 }
 0x1ca   :  { %v1010_v44 = vmul.f32 0.5, %v1003_v56  ;;  %v1015_v0 = vmul.f32 0.5, %v1005_v57 }
 0x1cb   :  { %2292 = vtanh.f32 %v1006_v3 }
 0x1cc   :  { %2294 = vtanh.f32 %v1010_v44 }
 0x1cd   :  { %2296 = vtanh.f32 %v1004_v41 }
 0x1ce   :  { %2298 = vtanh.f32 %v1015_v0 }
 0x1d5   :  { %v2293_v59 = vpop.eup %2292 }
 0x1d6   :  { %v2295_v1 = vpop.eup %2294  ;;  %v1008_v48 = vadd.f32 1.0, %v2293_v59 }
 0x1d7   :  { %v1012_v2 = vadd.f32 1.0, %v2295_v1  ;;  %v2297_v45 = vpop.eup %2296 }
 0x1d8   :  { %v1009_v52 = vmul.f32 0.5, %v1008_v48  ;;  %v2299_v54 = vpop.eup %2298 }
 0x1d9   :  { %v1013_v4 = vmul.f32 0.5, %v1012_v2  ;;  %v1017_v56 = vadd.f32 1.0, %v2299_v54 }
 0x1da   :  { %v1020_v61 = vmul.f32 %v2297_v45, %v1009_v52  ;;  %v3260_v45 = vmov 0  }
 0x1db   :  { %v1019_v9 = vmul.f32 0.0, %v1013_v4  ;;  %v1018_v3 = vmul.f32 0.5, %v1017_v56 }
 0x1dd   :  { %v2936_v49 = vadd.f32 %v1020_v61, %v1019_v9 }
 0x1df   :  { %2300 = vtanh.f32 %v2936_v49 }
 0x1e9   :  { %v2301_v44 = vpop.eup %2300 }
 0x1ea   :  { %v1023_v41 = vmul.f32 %v2301_v44, %v1018_v3 }
 0x1ec   :  { %v1024_v57 = vpack.c.bf16 %v1023_v41, %v1023_v41 }
 0x1ee   :  { %1062 = vmatmul.mubr.bf16.vlgmr.msra.gmra.mrb[20].mxu1 %v1024_v57  ;;  %1103 = vmatmul.mubr.bf16.vlgmr.msra.gmra.mrb[24].mxu0 %v1024_v57 }
 0x1ef   :  { %1139 = vmatpush1.bf16.msra.mxu1 %v2690_v5  ;;  %1180 = vmatpush1.bf16.msra.mxu0 %v2692_v6 }
 0x1f0   :  { %1140 = vmatprep.subr.bf16.mxu1 %v2695_v7  ;;  %1181 = vmatprep.subr.bf16.mxu0 %v2697_v8 }
 0x1f1   :  { %1170 = vmatprep.mubr.bf16.mxu1 %v3260_v45  ;;  %1211 = vmatprep.mubr.bf16.mxu0 %v3260_v45 }
 0x1f3   :  { %1141 = vmatpush1.bf16.msra.mxu1 %v2703_v10  ;;  %1182 = vmatpush1.bf16.msra.mxu0 %v2705_v11 }
 0x1f4   :  { %1142 = vmatprep.subr.bf16.mxu1 %v2709_v12  ;;  %1183 = vmatprep.subr.bf16.mxu0 %v2711_v13 }
 0x1f7   :  { %1143 = vmatpush1.bf16.msra.mxu1 %v2719_v15  ;;  %1184 = vmatpush1.bf16.msra.mxu0 %v2721_v16 }
 0x1f8   :  { %1144 = vmatprep.subr.bf16.mxu1 %v2725_v17  ;;  %1185 = vmatprep.subr.bf16.mxu0 %v2727_v18 }
 0x1fb   :  { %1145 = vmatpush1.bf16.msra.mxu1 %v2733_v21  ;;  %1186 = vmatpush1.bf16.msra.mxu0 %v2735_v22 }
 0x1fc   :  { %1146 = vmatprep.subr.bf16.mxu1 %v2739_v23  ;;  %1187 = vmatprep.subr.bf16.mxu0 %v2741_v24 }
 0x1ff   :  { %1147 = vmatpush1.bf16.msra.mxu1 %v2749_v25  ;;  %1188 = vmatpush1.bf16.msra.mxu0 %v2751_v26 }
 0x200   :  { %1148 = vmatprep.subr.bf16.mxu1 %v2755_v27  ;;  %1189 = vmatprep.subr.bf16.mxu0 %v2757_v28 }
 0x203   :  { %1149 = vmatpush1.bf16.msra.mxu1 %v2763_v31  ;;  %1190 = vmatpush1.bf16.msra.mxu0 %v2765_v32 }
 0x204   :  { %1150 = vmatprep.subr.bf16.mxu1 %v2769_v33  ;;  %1191 = vmatprep.subr.bf16.mxu0 %v2771_v34 }
 0x207   :  { %1151 = vmatpush1.bf16.msra.mxu1 %v2779_v35  ;;  %1192 = vmatpush1.bf16.msra.mxu0 %v2781_v36 }
 0x208   :  { %1152 = vmatprep.subr.bf16.mxu1 %v2785_v37  ;;  %1193 = vmatprep.subr.bf16.mxu0 %v2787_v38 }
 0x20b   :  { %1153 = vmatpush1.bf16.msra.mxu1 %v2793_v39  ;;  %1194 = vmatpush1.bf16.msra.mxu0 %v2795_v40 }
 0x20c   :  { %1247 = vmatprep.subr.bf16.mxu1 %v2680_v53  ;;  %1288 = vmatprep.subr.bf16.mxu0 %v2683_v62 }
 0x2c1   :  { %v1063_v63 = vpop.f32.mrb[20].mxu1  ;;  %v1104_v14 = vpop.f32.mrb[24].mxu0 }
 0x2c2   :  { %v1111_v58 = vadd.f32 %v1063_v63, %v2862_v20  ;;  %v1113_v30 = vadd.f32 %v1104_v14, %v2864_v29  ;;  %v1065_v0 = vpop.f32.mrb[21].mxu1  ;;  %v1106_v59 = vpop.f32.mrb[25].mxu0 }
 0x2c3   :  { %v1112_v1 = vadd.f32 %v1065_v0, %v2867_v42  ;;  %v1114_v48 = vadd.f32 %v1106_v59, %v2870_v43  ;;  %v1067_v2 = vpop.f32.mrb[22].mxu1  ;;  %v1108_v52 = vpop.f32.mrb[26].mxu0 }
 0x2c4   :  { %v1115_v4 = vmul.f32 0.5, %v1111_v58  ;;  %v1068_v61 = vpop.f32.mrb[23].mxu1  ;;  %v1109_v9 = vpop.f32.mrb[27].mxu0 }
 0x2c5   :  { %v1119_v54 = vmul.f32 0.5, %v1112_v1  ;;  %v1124_v56 = vmul.f32 0.5, %v1114_v48 }
 0x2c6   :  { %2302 = vtanh.f32 %v1115_v4 }
 0x2c7   :  { %2304 = vtanh.f32 %v1119_v54 }
 0x2c8   :  { %2306 = vtanh.f32 %v1113_v30 }
 0x2c9   :  { %2308 = vtanh.f32 %v1124_v56 }
 0x2d0   :  { %v2303_v3 = vpop.eup %2302 }
 0x2d1   :  { %v2305_v20 = vpop.eup %2304  ;;  %v1117_v44 = vadd.f32 1.0, %v2303_v3 }
 0x2d2   :  { %v1121_v29 = vadd.f32 1.0, %v2305_v20  ;;  %v2307_v57 = vpop.eup %2306 }
 0x2d3   :  { %v1118_v41 = vmul.f32 0.5, %v1117_v44  ;;  %v2309_v58 = vpop.eup %2308 }
 0x2d4   :  { %v1122_v42 = vmul.f32 0.5, %v1121_v29  ;;  %v1126_v0 = vadd.f32 1.0, %v2309_v58 }
 0x2d5   :  { %v1129_v63 = vmul.f32 %v2307_v57, %v1118_v41 }
 0x2d6   :  { %v1128_v43 = vmul.f32 %v1122_v42, %v2936_v49  ;;  %v1127_v59 = vmul.f32 0.5, %v1126_v0 }
 0x2d8   :  { %v2978_v14 = vadd.f32 %v1129_v63, %v1128_v43 }
 0x2da   :  { %2310 = vtanh.f32 %v2978_v14 }
 0x2e4   :  { %v2311_v30 = vpop.eup %2310 }
 0x2e5   :  { %v1132_v1 = vmul.f32 %v2311_v30, %v1127_v59 }
 0x2e7   :  { %v1133_v48 = vpack.c.bf16 %v1132_v1, %v1132_v1 }
 0x2e9   :  { %1171 = vmatmul.mubr.bf16.vlgmr.msra.gmra.mrb[24].mxu1 %v1133_v48  ;;  %1212 = vmatmul.mubr.bf16.vlgmr.msra.gmra.mrb[28].mxu0 %v1133_v48 }
 0x2ea   :  { %1248 = vmatpush1.bf16.msra.mxu1 %v2690_v5  ;;  %1289 = vmatpush1.bf16.msra.mxu0 %v2692_v6 }
 0x2eb   :  { %1249 = vmatprep.subr.bf16.mxu1 %v2695_v7  ;;  %1290 = vmatprep.subr.bf16.mxu0 %v2697_v8 }
 0x2ec   :  { %1279 = vmatprep.mubr.bf16.mxu1 %v3260_v45  ;;  %1320 = vmatprep.mubr.bf16.mxu0 %v3260_v45 }
 0x2ee   :  { %1250 = vmatpush1.bf16.msra.mxu1 %v2703_v10  ;;  %1291 = vmatpush1.bf16.msra.mxu0 %v2705_v11 }
 0x2ef   :  { %1251 = vmatprep.subr.bf16.mxu1 %v2709_v12  ;;  %1292 = vmatprep.subr.bf16.mxu0 %v2711_v13 }
 0x2f2   :  { %1252 = vmatpush1.bf16.msra.mxu1 %v2719_v15  ;;  %1293 = vmatpush1.bf16.msra.mxu0 %v2721_v16 }
 0x2f3   :  { %1253 = vmatprep.subr.bf16.mxu1 %v2725_v17  ;;  %1294 = vmatprep.subr.bf16.mxu0 %v2727_v18 }
 0x2f6   :  { %1254 = vmatpush1.bf16.msra.mxu1 %v2733_v21  ;;  %1295 = vmatpush1.bf16.msra.mxu0 %v2735_v22 }
 0x2f7   :  { %1255 = vmatprep.subr.bf16.mxu1 %v2739_v23  ;;  %1296 = vmatprep.subr.bf16.mxu0 %v2741_v24 }
 0x2fa   :  { %1256 = vmatpush1.bf16.msra.mxu1 %v2749_v25  ;;  %1297 = vmatpush1.bf16.msra.mxu0 %v2751_v26 }
 0x2fb   :  { %1257 = vmatprep.subr.bf16.mxu1 %v2755_v27  ;;  %1298 = vmatprep.subr.bf16.mxu0 %v2757_v28 }
 0x2fe   :  { %1258 = vmatpush1.bf16.msra.mxu1 %v2763_v31  ;;  %1299 = vmatpush1.bf16.msra.mxu0 %v2765_v32 }
 0x2ff   :  { %1259 = vmatprep.subr.bf16.mxu1 %v2769_v33  ;;  %1300 = vmatprep.subr.bf16.mxu0 %v2771_v34 }
 0x302   :  { %1260 = vmatpush1.bf16.msra.mxu1 %v2779_v35  ;;  %1301 = vmatpush1.bf16.msra.mxu0 %v2781_v36 }
 0x303   :  { %1261 = vmatprep.subr.bf16.mxu1 %v2785_v37  ;;  %1302 = vmatprep.subr.bf16.mxu0 %v2787_v38 }
 0x306   :  { %1262 = vmatpush1.bf16.msra.mxu1 %v2793_v39  ;;  %1303 = vmatpush1.bf16.msra.mxu0 %v2795_v40 }
 0x307   :  { %1356 = vmatprep.subr.bf16.mxu1 %v2680_v53  ;;  %1397 = vmatprep.subr.bf16.mxu0 %v2683_v62 }
 0x3bc   :  { %v1172_v49 = vpop.f32.mrb[24].mxu1  ;;  %v1213_v2 = vpop.f32.mrb[28].mxu0 }
 0x3bd   :  { %v1220_v52 = vadd.f32 %v1172_v49, %v2872_v46  ;;  %v1222_v4 = vadd.f32 %v1213_v2, %v2874_v47  ;;  %v1174_v61 = vpop.f32.mrb[25].mxu1  ;;  %v1215_v9 = vpop.f32.mrb[29].mxu0 }
 0x3be   :  { %v1221_v54 = vadd.f32 %v1174_v61, %v2877_v50  ;;  %v1223_v56 = vadd.f32 %v1215_v9, %v2880_v51  ;;  %v1176_v3 = vpop.f32.mrb[26].mxu1  ;;  %v1217_v20 = vpop.f32.mrb[30].mxu0 }
 0x3bf   :  { %v1224_v44 = vmul.f32 0.5, %v1220_v52  ;;  %v1177_v29 = vpop.f32.mrb[27].mxu1  ;;  %v1218_v41 = vpop.f32.mrb[31].mxu0  ;;  %v3261_v20 = vld [vmem:[#allocation16_spill] sm:$0xff] }
 0x3c0   :  { %v1228_v53 = vmul.f32 0.5, %v1221_v54  ;;  %v1233_v57 = vmul.f32 0.5, %v1223_v56  ;;  %v3262_v29 = vld [vmem:[#allocation17_spill] sm:$0xff] }
 0x3c1   :  { %2312 = vtanh.f32 %v1224_v44 }
 0x3c2   :  { %2314 = vtanh.f32 %v1228_v53 }
 0x3c3   :  { %2316 = vtanh.f32 %v1222_v4 }
 0x3c4   :  { %2318 = vtanh.f32 %v1233_v57 }
 0x3cb   :  { %v2313_v42 = vpop.eup %2312 }
 0x3cc   :  { %v2315_v46 = vpop.eup %2314  ;;  %v1226_v63 = vadd.f32 1.0, %v2313_v42 }
 0x3cd   :  { %v1230_v47 = vadd.f32 1.0, %v2315_v46  ;;  %v2317_v58 = vpop.eup %2316 }
 0x3ce   :  { %v1227_v43 = vmul.f32 0.5, %v1226_v63  ;;  %v2319_v30 = vpop.eup %2318 }
 0x3cf   :  { %v1231_v50 = vmul.f32 0.5, %v1230_v47  ;;  %v1235_v1 = vadd.f32 1.0, %v2319_v30 }
 0x3d0   :  { %v1238_v0 = vmul.f32 %v2317_v58, %v1227_v43 }
 0x3d1   :  { %v1237_v51 = vmul.f32 %v1231_v50, %v2978_v14  ;;  %v1236_v48 = vmul.f32 0.5, %v1235_v1  ;;  %v3055_v14 = vld [vmem:[#allocation8 + $0x4] ss:$16 sps:$4 sm:$0xff]  }
 0x3d3   :  { %v3020_v59 = vadd.f32 %v1238_v0, %v1237_v51 }
 0x3d5   :  { %2320 = vtanh.f32 %v3020_v59 }
 0x3df   :  { %v2321_v49 = vpop.eup %2320 }
 0x3e0   :  { %v1241_v2 = vmul.f32 %v2321_v49, %v1236_v48 }
 0x3e2   :  { %v1242_v52 = vpack.c.bf16 %v1241_v2, %v1241_v2 }
 0x3e4   :  { %1280 = vmatmul.mubr.bf16.vlgmr.msra.gmra.mrb[28].mxu1 %v1242_v52  ;;  %1321 = vmatmul.mubr.bf16.vlgmr.msra.gmra.mrb[32].mxu0 %v1242_v52 }
 0x3e5   :  { %1357 = vmatpush1.bf16.msra.mxu1 %v2690_v5  ;;  %1398 = vmatpush1.bf16.msra.mxu0 %v2692_v6 }
 0x3e6   :  { %1358 = vmatprep.subr.bf16.mxu1 %v2695_v7  ;;  %1399 = vmatprep.subr.bf16.mxu0 %v2697_v8 }
 0x3e7   :  { %1388 = vmatprep.mubr.bf16.mxu1 %v3260_v45  ;;  %1429 = vmatprep.mubr.bf16.mxu0 %v3260_v45 }
 0x3e9   :  { %1359 = vmatpush1.bf16.msra.mxu1 %v2703_v10  ;;  %1400 = vmatpush1.bf16.msra.mxu0 %v2705_v11 }
 0x3ea   :  { %1360 = vmatprep.subr.bf16.mxu1 %v2709_v12  ;;  %1401 = vmatprep.subr.bf16.mxu0 %v2711_v13 }
 0x3ed   :  { %1361 = vmatpush1.bf16.msra.mxu1 %v2719_v15  ;;  %1402 = vmatpush1.bf16.msra.mxu0 %v2721_v16 }
 0x3ee   :  { %1362 = vmatprep.subr.bf16.mxu1 %v2725_v17  ;;  %1403 = vmatprep.subr.bf16.mxu0 %v2727_v18 }
 0x3f1   :  { %1363 = vmatpush1.bf16.msra.mxu1 %v2733_v21  ;;  %1404 = vmatpush1.bf16.msra.mxu0 %v2735_v22 }
 0x3f2   :  { %1364 = vmatprep.subr.bf16.mxu1 %v2739_v23  ;;  %1405 = vmatprep.subr.bf16.mxu0 %v2741_v24 }
 0x3f5   :  { %1365 = vmatpush1.bf16.msra.mxu1 %v2749_v25  ;;  %1406 = vmatpush1.bf16.msra.mxu0 %v2751_v26 }
 0x3f6   :  { %1366 = vmatprep.subr.bf16.mxu1 %v2755_v27  ;;  %1407 = vmatprep.subr.bf16.mxu0 %v2757_v28 }
 0x3f9   :  { %1367 = vmatpush1.bf16.msra.mxu1 %v2763_v31  ;;  %1408 = vmatpush1.bf16.msra.mxu0 %v2765_v32 }
 0x3fa   :  { %1368 = vmatprep.subr.bf16.mxu1 %v2769_v33  ;;  %1409 = vmatprep.subr.bf16.mxu0 %v2771_v34 }
 0x3fd   :  { %1369 = vmatpush1.bf16.msra.mxu1 %v2779_v35  ;;  %1410 = vmatpush1.bf16.msra.mxu0 %v2781_v36 }
 0x3fe   :  { %1370 = vmatprep.subr.bf16.mxu1 %v2785_v37  ;;  %1411 = vmatprep.subr.bf16.mxu0 %v2787_v38 }
 0x401   :  { %1371 = vmatpush1.bf16.msra.mxu1 %v2793_v39  ;;  %1412 = vmatpush1.bf16.msra.mxu0 %v2795_v40 }
 0x402   :  { %1465 = vmatprep.subr.bf16.mxu1 %v3055_v14  ;;  %1506 = vmatprep.subr.bf16.mxu0 %v2683_v62 }
 0x4b7   :  { %v1281_v4 = vpop.f32.mrb[28].mxu1  ;;  %v1322_v61 = vpop.f32.mrb[32].mxu0 }
 0x4b8   :  { %v1329_v9 = vadd.f32 %v1281_v4, %v2882_v55  ;;  %v1331_v54 = vadd.f32 %v1322_v61, %v2884_v60  ;;  %v1283_v56 = vpop.f32.mrb[29].mxu1  ;;  %v1324_v3 = vpop.f32.mrb[33].mxu0 }
 0x4b9   :  { %v1330_v44 = vadd.f32 %v1283_v56, %v3261_v20  ;;  %v1332_v41 = vadd.f32 %v1324_v3, %v3262_v29  ;;  %v1285_v53 = vpop.f32.mrb[30].mxu1  ;;  %v1326_v57 = vpop.f32.mrb[34].mxu0 }
 0x4ba   :  { %v1333_v42 = vmul.f32 0.5, %v1329_v9  ;;  %v1286_v46 = vpop.f32.mrb[31].mxu1  ;;  %v1327_v63 = vpop.f32.mrb[35].mxu0 }
 0x4bb   :  { %v1337_v47 = vmul.f32 0.5, %v1330_v44  ;;  %v1342_v62 = vmul.f32 0.5, %v1332_v41 }
 0x4bc   :  { %2322 = vtanh.f32 %v1333_v42 }
 0x4bd   :  { %2324 = vtanh.f32 %v1337_v47 }
 0x4be   :  { %2326 = vtanh.f32 %v1331_v54 }
 0x4bf   :  { %2328 = vtanh.f32 %v1342_v62 }
 0x4c6   :  { %v2323_v43 = vpop.eup %2322 }
 0x4c7   :  { %v2325_v55 = vpop.eup %2324  ;;  %v1335_v58 = vadd.f32 1.0, %v2323_v43 }
 0x4c8   :  { %v1339_v60 = vadd.f32 1.0, %v2325_v55  ;;  %v2327_v0 = vpop.eup %2326 }
 0x4c9   :  { %v1336_v50 = vmul.f32 0.5, %v1335_v58  ;;  %v2329_v49 = vpop.eup %2328 }
 0x4ca   :  { %v1340_v51 = vmul.f32 0.5, %v1339_v60  ;;  %v1344_v2 = vadd.f32 1.0, %v2329_v49  ;;  %v3128_v49 = vld [vmem:[#allocation8 + $0x28] ss:$16 sps:$4 sm:$0xff]  }
 0x4cb   :  { %v1347_v30 = vmul.f32 %v2327_v0, %v1336_v50  ;;  %v3111_v0 = vld [vmem:[#allocation8] ss:$16 sps:$4 sm:$0xff]  }
 0x4cc   :  { %v1346_v1 = vmul.f32 %v1340_v51, %v3020_v59  ;;  %v1345_v52 = vmul.f32 0.5, %v1344_v2  ;;  %v3114_v51 = vld [vmem:[#allocation8 + $0x8] ss:$16 sps:$4 sm:$0xff]   ;;  %v3131_v2 = vld [vmem:[#allocation8 + $0x44] ss:$16 sps:$4 sm:$0xff]  }
 0x4ce   :  { %v3064_v48 = vadd.f32 %v1347_v30, %v1346_v1  ;;  %v3117_v30 = vld [vmem:[#allocation8 + $0x24] ss:$16 sps:$4 sm:$0xff]   ;;  %v3120_v1 = vld [vmem:[#allocation8 + $0x2c] ss:$16 sps:$4 sm:$0xff]  }
 0x4d0   :  { %2330 = vtanh.f32 %v3064_v48 }
 0x4da   :  { %v2331_v4 = vpop.eup %2330 }
 0x4db   :  { %v1350_v61 = vmul.f32 %v2331_v4, %v1345_v52  ;;  %v3134_v52 = vld [vmem:[#allocation8 + $0x4c] ss:$16 sps:$4 sm:$0xff]   ;;  %v3137_v4 = vld [vmem:[#allocation8 + $0x40] ss:$16 sps:$4 sm:$0xff]  }
 0x4dd   :  { %v1351_v9 = vpack.c.bf16 %v1350_v61, %v1350_v61  ;;  %v3140_v61 = vld [vmem:[#allocation8 + $0x48] ss:$16 sps:$4 sm:$0xff]  }
 0x4df   :  { %1389 = vmatmul.mubr.bf16.vlgmr.msra.gmra.mrb[32].mxu1 %v1351_v9  ;;  %1430 = vmatmul.mubr.bf16.vlgmr.msra.gmra.mrb[36].mxu0 %v1351_v9  ;;  %v3143_v9 = vld [vmem:[#allocation8 + $0x64] ss:$16 sps:$4 sm:$0xff]  }
 0x4e0   :  { %1466 = vmatpush1.bf16.msra.mxu1 %v2690_v5  ;;  %1507 = vmatpush1.bf16.msra.mxu0 %v2692_v6  ;;  %v3100_v5 = vld [vmem:[#allocation8 + $0xc] ss:$16 sps:$4 sm:$0xff]  }
 0x4e1   :  { %1467 = vmatprep.subr.bf16.mxu1 %v2695_v7  ;;  %1508 = vmatprep.subr.bf16.mxu0 %v2697_v8  ;;  %v3263_v8 = vld [vmem:[#allocation18_spill] sm:$0xff] }
 0x4e2   :  { %1497 = vmatprep.mubr.bf16.mxu1 %v3260_v45  ;;  %1538 = vmatprep.mubr.bf16.mxu0 %v3260_v45 }
 0x4e4   :  { %1468 = vmatpush1.bf16.msra.mxu1 %v2703_v10  ;;  %1509 = vmatpush1.bf16.msra.mxu0 %v2705_v11  ;;  %v3264_v11 = vld [vmem:[#allocation19_spill] sm:$0xff] }
 0x4e5   :  { %1469 = vmatprep.subr.bf16.mxu1 %v2709_v12  ;;  %1510 = vmatprep.subr.bf16.mxu0 %v2711_v13 }
 0x4e8   :  { %1470 = vmatpush1.bf16.msra.mxu1 %v2719_v15  ;;  %1511 = vmatpush1.bf16.msra.mxu0 %v2721_v16  ;;  %v3265_v16 = vld [vmem:[#allocation20_spill] sm:$0xff] }
 0x4e9   :  { %1471 = vmatprep.subr.bf16.mxu1 %v2725_v17  ;;  %1512 = vmatprep.subr.bf16.mxu0 %v2727_v18  ;;  %v3266_v18 = vld [vmem:[#allocation21_spill] sm:$0xff] }
 0x4ec   :  { %1472 = vmatpush1.bf16.msra.mxu1 %v2733_v21  ;;  %1513 = vmatpush1.bf16.msra.mxu0 %v2735_v22 }
 0x4ed   :  { %1473 = vmatprep.subr.bf16.mxu1 %v2739_v23  ;;  %1514 = vmatprep.subr.bf16.mxu0 %v2741_v24 }
 0x4f0   :  { %1474 = vmatpush1.bf16.msra.mxu1 %v2749_v25  ;;  %1515 = vmatpush1.bf16.msra.mxu0 %v2751_v26 }
 0x4f1   :  { %1475 = vmatprep.subr.bf16.mxu1 %v2755_v27  ;;  %1516 = vmatprep.subr.bf16.mxu0 %v2757_v28 }
 0x4f4   :  { %1476 = vmatpush1.bf16.msra.mxu1 %v2763_v31  ;;  %1517 = vmatpush1.bf16.msra.mxu0 %v2765_v32 }
 0x4f5   :  { %1477 = vmatprep.subr.bf16.mxu1 %v2769_v33  ;;  %1518 = vmatprep.subr.bf16.mxu0 %v2771_v34 }
 0x4f8   :  { %1478 = vmatpush1.bf16.msra.mxu1 %v2779_v35  ;;  %1519 = vmatpush1.bf16.msra.mxu0 %v2781_v36 }
 0x4f9   :  { %1479 = vmatprep.subr.bf16.mxu1 %v2785_v37  ;;  %1520 = vmatprep.subr.bf16.mxu0 %v2787_v38 }
 0x4fc   :  { %1480 = vmatpush1.bf16.msra.mxu1 %v2793_v39  ;;  %1521 = vmatpush1.bf16.msra.mxu0 %v2795_v40 }
 0x4fd   :  { %1574 = vmatprep.subr.bf16.mxu1 %v3055_v14  ;;  %1615 = vmatprep.subr.bf16.mxu0 %v3100_v5 }
 0x5b2   :  { %v1390_v6 = vpop.f32.mrb[32].mxu1  ;;  %v1431_v7 = vpop.f32.mrb[36].mxu0 }
 0x5b3   :  { %v1438_v10 = vadd.f32 %v1390_v6, %v3263_v8  ;;  %v1440_v12 = vadd.f32 %v1431_v7, %v3264_v11  ;;  %v1392_v13 = vpop.f32.mrb[33].mxu1  ;;  %v1433_v15 = vpop.f32.mrb[37].mxu0  ;;  %v3146_v6 = vld [vmem:[#allocation8 + $0x6c] ss:$16 sps:$4 sm:$0xff]   ;;  %v3149_v7 = vld [vmem:[#allocation8 + $0x60] ss:$16 sps:$4 sm:$0xff]  }
 0x5b4   :  { %v1439_v17 = vadd.f32 %v1392_v13, %v3265_v16  ;;  %v1441_v21 = vadd.f32 %v1433_v15, %v3266_v18  ;;  %v1394_v22 = vpop.f32.mrb[34].mxu1  ;;  %v1435_v23 = vpop.f32.mrb[38].mxu0  ;;  %v3152_v8 = vld [vmem:[#allocation8 + $0x68] ss:$16 sps:$4 sm:$0xff]   ;;  %v3158_v11 = vld [vmem:[#allocation8 + $0x8c] ss:$16 sps:$4 sm:$0xff]  }
 0x5b5   :  { %v1442_v24 = vmul.f32 0.5, %v1438_v10  ;;  %v1395_v59 = vpop.f32.mrb[35].mxu1  ;;  %v1436_v54 = vpop.f32.mrb[39].mxu0  ;;  %v3155_v10 = vld [vmem:[#allocation8 + $0x84] ss:$16 sps:$4 sm:$0xff]  }
 0x5b6   :  { %v1446_v56 = vmul.f32 0.5, %v1439_v17  ;;  %v1451_v3 = vmul.f32 0.5, %v1441_v21 }
 0x5b7   :  { %2332 = vtanh.f32 %v1442_v24 }
 0x5b8   :  { %2334 = vtanh.f32 %v1446_v56 }
 0x5b9   :  { %2336 = vtanh.f32 %v1440_v12 }
 0x5ba   :  { %2338 = vtanh.f32 %v1451_v3 }
 0x5c1   :  { %v2333_v20 = vpop.eup %2332 }
 0x5c2   :  { %v2335_v44 = vpop.eup %2334  ;;  %v1444_v29 = vadd.f32 1.0, %v2333_v20 }
 0x5c3   :  { %v1448_v41 = vadd.f32 1.0, %v2335_v44  ;;  %v2337_v57 = vpop.eup %2336 }
 0x5c4   :  { %v1445_v53 = vmul.f32 0.5, %v1444_v29  ;;  %v2339_v62 = vpop.eup %2338 }
 0x5c5   :  { %v1449_v42 = vmul.f32 0.5, %v1448_v41  ;;  %v1453_v43 = vadd.f32 1.0, %v2339_v62  ;;  %v2398_v62 = vld [vmem:[#allocation8 + $0xc4] ss:$16 sps:$4 sm:$0xff]  }
 0x5c6   :  { %v1456_v46 = vmul.f32 %v2337_v57, %v1445_v53  ;;  %v2393_v57 = vld [vmem:[#allocation8 + $0x88] ss:$16 sps:$4 sm:$0xff]  }
 0x5c7   :  { %v1455_v63 = vmul.f32 %v1449_v42, %v3064_v48  ;;  %v1454_v55 = vmul.f32 0.5, %v1453_v43  ;;  %v3125_v48 = vld [vmem:[#allocation8 + $0x20] ss:$16 sps:$4 sm:$0xff]   ;;  %v2394_v42 = vld [vmem:[#allocation8 + $0xa4] ss:$16 sps:$4 sm:$0xff]  }
 0x5c8   :  { %v2399_v43 = vld [vmem:[#allocation8 + $0xcc] ss:$16 sps:$4 sm:$0xff]  }
 0x5c9   :  { %v3108_v47 = vadd.f32 %v1456_v46, %v1455_v63  ;;  %v2395_v46 = vld [vmem:[#allocation8 + $0xac] ss:$16 sps:$4 sm:$0xff]   ;;  %v2396_v63 = vld [vmem:[#allocation8 + $0xa0] ss:$16 sps:$4 sm:$0xff]  }
 0x5cb   :  { %2340 = vtanh.f32 %v3108_v47 }
 0x5d5   :  { %v2341_v58 = vpop.eup %2340 }
 0x5d6   :  { %v1459_v60 = vmul.f32 %v2341_v58, %v1454_v55  ;;  %v2400_v55 = vld [vmem:[#allocation8 + $0xc0] ss:$16 sps:$4 sm:$0xff]   ;;  %v2401_v58 = vld [vmem:[#allocation8 + $0xc8] ss:$16 sps:$4 sm:$0xff]  }
 0x5d8   :  { %v1460_v50 = vpack.c.bf16 %v1459_v60, %v1459_v60  ;;  %v2402_v60 = vld [vmem:[#allocation8 + $0xe4] ss:$16 sps:$4 sm:$0xff]  }
 0x5da   :  { %1498 = vmatmul.mubr.bf16.vlgmr.msra.gmra.mrb[36].mxu1 %v1460_v50  ;;  %1539 = vmatmul.mubr.bf16.vlgmr.msra.gmra.mrb[40].mxu0 %v1460_v50  ;;  %v2403_v50 = vld [vmem:[#allocation8 + $0xec] ss:$16 sps:$4 sm:$0xff]  }
 0x5db   :  { %1575 = vmatpush1.bf16.msra.mxu1 %v3111_v0  ;;  %1616 = vmatpush1.bf16.msra.mxu0 %v3114_v51 }
 0x5dc   :  { %1576 = vmatprep.subr.bf16.mxu1 %v3117_v30  ;;  %1617 = vmatprep.subr.bf16.mxu0 %v3120_v1 }
 0x5dd   :  { %1606 = vmatprep.mubr.bf16.mxu1 %v3260_v45  ;;  %1647 = vmatprep.mubr.bf16.mxu0 %v3260_v45 }
 0x5df   :  { %1577 = vmatpush1.bf16.msra.mxu1 %v3125_v48  ;;  %1618 = vmatpush1.bf16.msra.mxu0 %v3128_v49 }
 0x5e0   :  { %1578 = vmatprep.subr.bf16.mxu1 %v3131_v2  ;;  %1619 = vmatprep.subr.bf16.mxu0 %v3134_v52 }
 0x5e3   :  { %1579 = vmatpush1.bf16.msra.mxu1 %v3137_v4  ;;  %1620 = vmatpush1.bf16.msra.mxu0 %v3140_v61 }
 0x5e4   :  { %1580 = vmatprep.subr.bf16.mxu1 %v3143_v9  ;;  %1621 = vmatprep.subr.bf16.mxu0 %v3146_v6 }
 0x5e7   :  { %1581 = vmatpush1.bf16.msra.mxu1 %v3149_v7  ;;  %1622 = vmatpush1.bf16.msra.mxu0 %v3152_v8 }
 0x5e8   :  { %1582 = vmatprep.subr.bf16.mxu1 %v3155_v10  ;;  %1623 = vmatprep.subr.bf16.mxu0 %v3158_v11 }
 0x5eb   :  { %1583 = vmatpush1.bf16.msra.mxu1 %v2749_v25  ;;  %1624 = vmatpush1.bf16.msra.mxu0 %v2751_v26 }
 0x5ec   :  { %1584 = vmatprep.subr.bf16.mxu1 %v2755_v27  ;;  %1625 = vmatprep.subr.bf16.mxu0 %v2757_v28  ;;  %v3267_v27 = vld [vmem:[#allocation22_spill] sm:$0xff] }
 0x5ef   :  { %1585 = vmatpush1.bf16.msra.mxu1 %v2763_v31  ;;  %1626 = vmatpush1.bf16.msra.mxu0 %v2765_v32  ;;  %v3268_v31 = vld [vmem:[#allocation23_spill] sm:$0xff] }
 0x5f0   :  { %1586 = vmatprep.subr.bf16.mxu1 %v2769_v33  ;;  %1627 = vmatprep.subr.bf16.mxu0 %v2771_v34 }
 0x5f3   :  { %1587 = vmatpush1.bf16.msra.mxu1 %v2779_v35  ;;  %1628 = vmatpush1.bf16.msra.mxu0 %v2781_v36  ;;  %v3269_v35 = vld [vmem:[#allocation24_spill] sm:$0xff] }
 0x5f4   :  { %1588 = vmatprep.subr.bf16.mxu1 %v2785_v37  ;;  %1629 = vmatprep.subr.bf16.mxu0 %v2787_v38  ;;  %v3270_v37 = vld [vmem:[#allocation25_spill] sm:$0xff] }
 0x5f7   :  { %1589 = vmatpush1.bf16.msra.mxu1 %v2793_v39  ;;  %1630 = vmatpush1.bf16.msra.mxu0 %v2795_v40 }
 0x5f8   :  { %1683 = vmatprep.subr.bf16.mxu1 %v3055_v14  ;;  %1724 = vmatprep.subr.bf16.mxu0 %v3100_v5 }
 0x6ad   :  { %v1499_v25 = vpop.f32.mrb[36].mxu1  ;;  %v1540_v26 = vpop.f32.mrb[40].mxu0 }
 0x6ae   :  { %v1547_v28 = vadd.f32 %v1499_v25, %v3267_v27  ;;  %v1549_v32 = vadd.f32 %v1540_v26, %v3268_v31  ;;  %v1501_v33 = vpop.f32.mrb[37].mxu1  ;;  %v1542_v34 = vpop.f32.mrb[41].mxu0 }
 0x6af   :  { %v1548_v36 = vadd.f32 %v1501_v33, %v3269_v35  ;;  %v1550_v38 = vadd.f32 %v1542_v34, %v3270_v37  ;;  %v1503_v12 = vpop.f32.mrb[38].mxu1  ;;  %v1544_v39 = vpop.f32.mrb[42].mxu0 }
 0x6b0   :  { %v1551_v13 = vmul.f32 0.5, %v1547_v28  ;;  %v1504_v40 = vpop.f32.mrb[39].mxu1  ;;  %v1545_v15 = vpop.f32.mrb[43].mxu0 }
 0x6b1   :  { %v1555_v14 = vmul.f32 0.5, %v1548_v36  ;;  %v1560_v5 = vmul.f32 0.5, %v1550_v38 }
 0x6b2   :  { %2342 = vtanh.f32 %v1551_v13 }
 0x6b3   :  { %2344 = vtanh.f32 %v1555_v14 }
 0x6b4   :  { %2346 = vtanh.f32 %v1549_v32 }
 0x6b5   :  { %2348 = vtanh.f32 %v1560_v5 }
 0x6bc   :  { %v2343_v16 = vpop.eup %2342 }
 0x6bd   :  { %v2345_v17 = vpop.eup %2344  ;;  %v1553_v18 = vadd.f32 1.0, %v2343_v16 }
 0x6be   :  { %v1557_v21 = vadd.f32 1.0, %v2345_v17  ;;  %v2347_v23 = vpop.eup %2346 }
 0x6bf   :  { %v1554_v22 = vmul.f32 0.5, %v1553_v18  ;;  %v2349_v3 = vpop.eup %2348  ;;  %v2274_v18 = vld [vmem:[#allocation9 + $0x40] sm:$0xff]  }
 0x6c0   :  { %v1558_v24 = vmul.f32 0.5, %v1557_v21  ;;  %v1562_v20 = vadd.f32 1.0, %v2349_v3  ;;  %v2275_v21 = vld [vmem:[#allocation9] sm:$0xff]  }
 0x6c1   :  { %v1565_v59 = vmul.f32 %v2347_v23, %v1554_v22  ;;  %v2276_v22 = vld [vmem:[#allocation9 + $0x48] sm:$0xff]   ;;  %v2282_v3 = vld [vmem:[#allocation9 + $0x60] sm:$0xff]  }
 0x6c2   :  { %v1564_v54 = vmul.f32 %v1558_v24, %v3108_v47  ;;  %v1563_v44 = vmul.f32 0.5, %v1562_v20  ;;  %v2397_v47 = vld [vmem:[#allocation8 + $0xa8] ss:$16 sps:$4 sm:$0xff]   ;;  %v2278_v24 = vld [vmem:[#allocation9 + $0x50] sm:$0xff]   ;;  %v2283_v20 = vld [vmem:[#allocation9 + $0x20] sm:$0xff]  }
 0x6c3   :  { %v2277_v23 = vld [vmem:[#allocation9 + $0x8] sm:$0xff]  }
 0x6c4   :  { %v3182_v56 = vadd.f32 %v1565_v59, %v1564_v54  ;;  %v2279_v59 = vld [vmem:[#allocation9 + $0x10] sm:$0xff]   ;;  %v2280_v54 = vld [vmem:[#allocation9 + $0x58] sm:$0xff]  }
 0x6c6   :  { %2350 = vtanh.f32 %v3182_v56 }
 0x6d0   :  { %v2351_v29 = vpop.eup %2350 }
 0x6d1   :  { %v1568_v41 = vmul.f32 %v2351_v29, %v1563_v44  ;;  %v2284_v44 = vld [vmem:[#allocation9 + $0x68] sm:$0xff]  }
 0x6d2   :  { %v2285_v29 = vld [vmem:[#allocation9 + $0x28] sm:$0xff]  }
 0x6d3   :  { %v1569_v53 = vpack.c.bf16 %v1568_v41, %v1568_v41  ;;  %v2286_v41 = vld [vmem:[#allocation9 + $0x70] sm:$0xff]  }
 0x6d5   :  { %1607 = vmatmul.mubr.bf16.vlgmr.msra.gmra.mrb[40].mxu1 %v1569_v53  ;;  %1648 = vmatmul.mubr.bf16.vlgmr.msra.gmra.mrb[44].mxu0 %v1569_v53  ;;  %v2287_v53 = vld [vmem:[#allocation9 + $0x30] sm:$0xff]  }
 0x6d6   :  { %1684 = vmatpush1.bf16.msra.mxu1 %v3111_v0  ;;  %1725 = vmatpush1.bf16.msra.mxu0 %v3114_v51  ;;  %v2404_v0 = vld [vmem:[#allocation8 + $0xe0] ss:$16 sps:$4 sm:$0xff]   ;;  %v2405_v51 = vld [vmem:[#allocation8 + $0xe8] ss:$16 sps:$4 sm:$0xff]  }
 0x6d7   :  { %1685 = vmatprep.subr.bf16.mxu1 %v3117_v30  ;;  %1726 = vmatprep.subr.bf16.mxu0 %v3120_v1 }
 0x6d8   :  { %1715 = vmatprep.mubr.bf16.mxu1 %v3260_v45  ;;  %1756 = vmatprep.mubr.bf16.mxu0 %v3260_v45  ;;  %v2392_v45 = vld [vmem:[#allocation8 + $0x80] ss:$16 sps:$4 sm:$0xff]  }
 0x6da   :  { %1686 = vmatpush1.bf16.msra.mxu1 %v3125_v48  ;;  %1727 = vmatpush1.bf16.msra.mxu0 %v3128_v49  ;;  %v3271_v48 = vld [vmem:[#allocation26_spill] sm:$0xff] }
 0x6db   :  { %1687 = vmatprep.subr.bf16.mxu1 %v3131_v2  ;;  %1728 = vmatprep.subr.bf16.mxu0 %v3134_v52  ;;  %v3272_v2 = vld [vmem:[#allocation27_spill] sm:$0xff] }
 0x6de   :  { %1688 = vmatpush1.bf16.msra.mxu1 %v3137_v4  ;;  %1729 = vmatpush1.bf16.msra.mxu0 %v3140_v61 }
 0x6df   :  { %1689 = vmatprep.subr.bf16.mxu1 %v3143_v9  ;;  %1730 = vmatprep.subr.bf16.mxu0 %v3146_v6  ;;  %v3273_v9 = vld [vmem:[#allocation28_spill] sm:$0xff] }
 0x6e2   :  { %1690 = vmatpush1.bf16.msra.mxu1 %v3149_v7  ;;  %1731 = vmatpush1.bf16.msra.mxu0 %v3152_v8  ;;  %v3274_v7 = vld [vmem:[#allocation29_spill] sm:$0xff] }
 0x6e3   :  { %1691 = vmatprep.subr.bf16.mxu1 %v3155_v10  ;;  %1732 = vmatprep.subr.bf16.mxu0 %v3158_v11 }
 0x6e6   :  { %1692 = vmatpush1.bf16.msra.mxu1 %v2392_v45  ;;  %1733 = vmatpush1.bf16.msra.mxu0 %v2393_v57  ;;  %v2288_v45 = vld [vmem:[#allocation9 + $0x78] sm:$0xff]  }
 0x6e7   :  { %1693 = vmatprep.subr.bf16.mxu1 %v2394_v42  ;;  %1734 = vmatprep.subr.bf16.mxu0 %v2395_v46  ;;  %v2289_v57 = vld [vmem:[#allocation9 + $0x38] sm:$0xff]  }
 0x6ea   :  { %1694 = vmatpush1.bf16.msra.mxu1 %v2396_v63  ;;  %1735 = vmatpush1.bf16.msra.mxu0 %v2397_v47  ;;  %v3275_v47 = vld [vmem:[#allocation30_spill] sm:$0xff] }
 0x6eb   :  { %1695 = vmatprep.subr.bf16.mxu1 %v2398_v62  ;;  %1736 = vmatprep.subr.bf16.mxu0 %v2399_v43 }
 0x6ee   :  { %1696 = vmatpush1.bf16.msra.mxu1 %v2400_v55  ;;  %1737 = vmatpush1.bf16.msra.mxu0 %v2401_v58  ;;  %v3276_v58 = vld [vmem:[#allocation31_spill] sm:$0xff] }
 0x6ef   :  { %1697 = vmatprep.subr.bf16.mxu1 %v2402_v60  ;;  %1738 = vmatprep.subr.bf16.mxu0 %v2403_v50  ;;  %v3277_v50 = vld [vmem:[#allocation32_spill] sm:$0xff] }
 0x6f2   :  { %1698 = vmatpush1.bf16.msra.mxu1 %v2404_v0  ;;  %1739 = vmatpush1.bf16.msra.mxu0 %v2405_v51 }
 0x6f3   :  { %2127 = vmatprep.subr.bf16.mxu1 %v2274_v18 }
 0x7a8   :  { %v1608_v30 = vpop.f32.mrb[40].mxu1  ;;  %v1649_v1 = vpop.f32.mrb[44].mxu0 }
 0x7a9   :  { %v1656_v49 = vadd.f32 %v1608_v30, %v3271_v48  ;;  %v1658_v52 = vadd.f32 %v1649_v1, %v3272_v2  ;;  %v1610_v4 = vpop.f32.mrb[41].mxu1  ;;  %v1651_v61 = vpop.f32.mrb[45].mxu0 }
 0x7aa   :  { %v1657_v6 = vadd.f32 %v1610_v4, %v3273_v9  ;;  %v1659_v8 = vadd.f32 %v1651_v61, %v3274_v7  ;;  %v1612_v10 = vpop.f32.mrb[42].mxu1  ;;  %v1653_v11 = vpop.f32.mrb[46].mxu0 }
 0x7ab   :  { %v1660_v25 = vmul.f32 0.5, %v1656_v49  ;;  %v1613_v26 = vpop.f32.mrb[43].mxu1  ;;  %v1654_v27 = vpop.f32.mrb[47].mxu0 }
 0x7ac   :  { %v1664_v28 = vmul.f32 0.5, %v1657_v6  ;;  %v1669_v31 = vmul.f32 0.5, %v1659_v8 }
 0x7ad   :  { %2352 = vtanh.f32 %v1660_v25 }
 0x7ae   :  { %2354 = vtanh.f32 %v1664_v28 }
 0x7af   :  { %2356 = vtanh.f32 %v1658_v52 }
 0x7b0   :  { %2358 = vtanh.f32 %v1669_v31 }
 0x7b7   :  { %v2353_v32 = vpop.eup %2352 }
 0x7b8   :  { %v2355_v33 = vpop.eup %2354  ;;  %v1662_v34 = vadd.f32 1.0, %v2353_v32 }
 0x7b9   :  { %v1666_v35 = vadd.f32 1.0, %v2355_v33  ;;  %v2357_v37 = vpop.eup %2356 }
 0x7ba   :  { %v1663_v36 = vmul.f32 0.5, %v1662_v34  ;;  %v2359_v40 = vpop.eup %2358 }
 0x7bb   :  { %v1667_v38 = vmul.f32 0.5, %v1666_v35  ;;  %v1671_v15 = vadd.f32 1.0, %v2359_v40 }
 0x7bc   :  { %v1674_v12 = vmul.f32 %v2357_v37, %v1663_v36  ;;  %v2088_v36 = vld [vmem:[%s3239_s8] ss:$0 sm:$0xff] }
 0x7bd   :  { %v1673_v39 = vmul.f32 %v1667_v38, %v3182_v56  ;;  %v1672_v14 = vmul.f32 0.5, %v1671_v15  ;;  %v2281_v56 = vld [vmem:[#allocation9 + $0x18] sm:$0xff]  }
 0x7bf   :  { %v3208_v13 = vadd.f32 %v1674_v12, %v1673_v39 }
 0x7c1   :  { %2360 = vtanh.f32 %v3208_v13 }
 0x7cb   :  { %v2361_v5 = vpop.eup %2360 }
 0x7cc   :  { %v1677_v16 = vmul.f32 %v2361_v5, %v1672_v14 }
 0x7ce   :  { %v1678_v17 = vpack.c.bf16 %v1677_v16, %v1677_v16 }
 0x7d0   :  { %1716 = vmatmul.mubr.bf16.vlgmr.msra.gmra.mrb[44].mxu1 %v1678_v17  ;;  %1757 = vmatmul.mubr.bf16.vlgmr.msra.gmra.mrb[48].mxu0 %v1678_v17 }
 0x7d1   :  { %2128 = vmatpush3.bf16.msra.mxu1 %v2275_v21 }
 0x7d2   :  { %2129 = vmatprep.subr.bf16.mxu1 %v2276_v22 }
 0x7d5   :  { %2130 = vmatpush3.bf16.msra.mxu1 %v2277_v23 }
 0x7d6   :  { %2131 = vmatprep.subr.bf16.mxu1 %v2278_v24 }
 0x7d9   :  { %2132 = vmatpush3.bf16.msra.mxu1 %v2279_v59 }
 0x7da   :  { %2133 = vmatprep.subr.bf16.mxu1 %v2280_v54 }
 0x7dd   :  { %2134 = vmatpush3.bf16.msra.mxu1 %v2281_v56 }
 0x7de   :  { %2135 = vmatprep.subr.bf16.mxu1 %v2282_v3 }
 0x7e1   :  { %2136 = vmatpush3.bf16.msra.mxu1 %v2283_v20 }
 0x7e2   :  { %2137 = vmatprep.subr.bf16.mxu1 %v2284_v44 }
 0x7e5   :  { %2138 = vmatpush3.bf16.msra.mxu1 %v2285_v29 }
 0x7e6   :  { %2139 = vmatprep.subr.bf16.mxu1 %v2286_v41 }
 0x7e9   :  { %2140 = vmatpush3.bf16.msra.mxu1 %v2287_v53 }
 0x7ea   :  { %2141 = vmatprep.subr.bf16.mxu1 %v2288_v45 }
 0x7ed   :  { %2142 = vmatpush3.bf16.msra.mxu1 %v2289_v57 }
 0x8a3   :  { %v1717_v42 = vpop.f32.mrb[44].mxu1  ;;  %v1758_v46 = vpop.f32.mrb[48].mxu0 }
 0x8a4   :  { %v1765_v63 = vadd.f32 %v1717_v42, %v2922_v19  ;;  %v1767_v62 = vadd.f32 %v1758_v46, %v3275_v47  ;;  %v1719_v43 = vpop.f32.mrb[45].mxu1  ;;  %v1760_v55 = vpop.f32.mrb[49].mxu0 }
 0x8a5   :  { %v1766_v60 = vadd.f32 %v1719_v43, %v3276_v58  ;;  %v1768_v0 = vadd.f32 %v1760_v55, %v3277_v50  ;;  %v1721_v51 = vpop.f32.mrb[46].mxu1  ;;  %v1762_v30 = vpop.f32.mrb[50].mxu0 }
 0x8a6   :  { %v1769_v1 = vmul.f32 0.5, %v1765_v63  ;;  %v1722_v48 = vpop.f32.mrb[47].mxu1  ;;  %v1763_v49 = vpop.f32.mrb[51].mxu0 }
 0x8a7   :  { %v1773_v2 = vmul.f32 0.5, %v1766_v60  ;;  %v1778_v52 = vmul.f32 0.5, %v1768_v0 }
 0x8a8   :  { %2362 = vtanh.f32 %v1769_v1 }
 0x8a9   :  { %2364 = vtanh.f32 %v1773_v2 }
 0x8aa   :  { %2366 = vtanh.f32 %v1767_v62 }
 0x8ab   :  { %2368 = vtanh.f32 %v1778_v52 }
 0x8b2   :  { %v2363_v4 = vpop.eup %2362 }
 0x8b3   :  { %v2365_v19 = vpop.eup %2364  ;;  %v1771_v61 = vadd.f32 1.0, %v2363_v4 }
 0x8b4   :  { %v1775_v9 = vadd.f32 1.0, %v2365_v19  ;;  %v2367_v7 = vpop.eup %2366 }
 0x8b5   :  { %v1772_v6 = vmul.f32 0.5, %v1771_v61  ;;  %v2369_v27 = vpop.eup %2368 }
 0x8b6   :  { %v1776_v8 = vmul.f32 0.5, %v1775_v9  ;;  %v1780_v28 = vadd.f32 1.0, %v2369_v27 }
 0x8b7   :  { %v1783_v10 = vmul.f32 %v2367_v7, %v1772_v6 }
 0x8b8   :  { %v1782_v11 = vmul.f32 %v1776_v8, %v3208_v13  ;;  %v1781_v31 = vmul.f32 0.5, %v1780_v28 }
 0x8ba   :  { %v1784_v25 = vadd.f32 %v1783_v10, %v1782_v11 }
 0x8bc   :  { %2370 = vtanh.f32 %v1784_v25  ;;  %v1788_v26 = vpack.c.bf16 %v1784_v25, %v1784_v25 }
 0x8be   :  { %1956 = vmatprep.mubr.bf16.mxu1 %v1788_v26 }
 0x8c6   :  { %v2371_v32 = vpop.eup %2370 }
 0x8c7   :  { %v1786_v33 = vmul.f32 %v2371_v32, %v1781_v31 }
 0x8c9   :  { %v1787_v34 = vpack.c.bf16 %v1786_v33, %v1786_v33 }
 0x8cb   :  { %1957 = vmatmul.mubr.bf16.vlgmr.msra.gmra.mrb[48].mxu1 %v1787_v34 }
 0x99e   :  { %v2143_v35 = vpop.f32.mrb[48].mxu1 }
 0x99f   :  { %v2144_v37 = vpop.f32.mrb[49].mxu1 }
 0x9a0   :  { %v2145_v38 = vadd.f32 %v2144_v37, %v2143_v35  ;;  %v2146_v12 = vpop.f32.mrb[50].mxu1 }
 0x9a1   :  { %v2147_v39 = vpop.f32.mrb[51].mxu1 }
 0x9a2   :  { %v1959_v13 = vadd.f32 %v2145_v38, %v2088_v36 }
 0x9a4   :  { %2372 = vtanh.f32 %v1959_v13 }
 0x9ae   :  { %v2373_v40 = vpop.eup %2372 }
 0x9af   :  { %1965 = vst [vmem:[#allocation11 + $0x8] sm:$0xff] %v2373_v40 }
 0x9b0   :  { %2505 = shalt.err (!%p2502_p8)
}
 0x9b1   :  { %s2506_s16 = scalar_lea.hbm %s3240_s9, 256 }
 0x9b2   :  { %p2507_p9 = scmp.ne.s32.totalorder %s3240_s9, %s2506_s16  ;;  %p2510_p10 = scmp.lt.u32.totalorder %s2506_s16, %s3240_s9 }
 0x9b4   :  { %p2512_p11 = pnand %p2510_p10, %p2507_p9 }
 0x9b6   :  { %2515 = shalt.err (!%p2512_p11)
}
 0x9b7   :  { %1975 = dma.vmem_to_hbm [thread:$0]  %s1973_s5, 256, %s3240_s9, [#allocation5]  }
 0x9b8   :  { %2522 = dma.done.wait [#allocation5], 256  }
 0x9b9   :  { %2523 = vsyncadd [#allocation5], 4294967040 }
 0x9ba   :  { %1979 = vsyncpa [#allocation4], 1 }
 0x9bb   :  { %1980 = vsyncpa [#allocation7], 1 }
 0x9bc   :  { %1981 = vsyncpa [#allocation10], 1 }
 0x9bd   :  { %1982 = vsyncpa [#allocation5], 1 }

</bundles_post_ra>
